<compile_context>
chip_gen: v6e
topology: v6e:2x2x1
jax: 0.10.0
libtpu: 0.0.40
codegen_flags: <defaults>
</compile_context>

<pallas_src>
import functools

import jax
import jax.numpy as jnp
import numpy as np
from jax import lax
from jax.experimental import pallas as pl
from jax.experimental.pallas import tpu as pltpu


# ----------------------------- Pallas kernel -------------------------------

def _spatial_attention_kernel(x_ref, w_ref, o_ref, shift_ref, *, kh, kw, pad):
    # x_ref    : (C, H, W)            VMEM block, native input dtype
    # w_ref    : (2*kh*kw,) f32       SMEM conv weights, layout [cin][ky][kx]
    # o_ref    : (H, W)               VMEM output block
    # shift_ref: (2*kw, H+2*pad, W)   VMEM, lane-pre-shifted zero-padded planes
    c, h, w = x_ref.shape
    f32 = jnp.float32

    # ---- single-pass channel mean/max: one (H, W) plane live at a time ----
    def red_body(ci, carry):
        s, m = carry
        plane = x_ref[ci].astype(f32)          # per-plane upcast (bf16-friendly)
        return s + plane, jnp.maximum(m, plane)

    csum, cmax = lax.fori_loop(
        0, c, red_body,
        (jnp.zeros((h, w), f32), jnp.full((h, w), -jnp.inf, f32)),
        unroll=True)
    cavg = csum * (1.0 / c)

    # ---- zero-padded planes built in-register; pre-shift along lanes ------
    # Only 2*kw (=14) lane shifts total (instead of one per tap = 98).  The
    # halo comes from the concatenated zeros, so no scratch memset is needed
    # and shift_ref is fully overwritten every grid step.
    wr = w + 2 * pad
    zrow = jnp.zeros((pad, wr), f32)
    zcol = jnp.zeros((h, pad), f32)
    for ci, feat in enumerate((cavg, cmax)):
        padded = jnp.concatenate([zcol, feat, zcol], axis=1)      # (H,    W+2p)
        padded = jnp.concatenate([zrow, padded, zrow], axis=0)    # (H+2p, W+2p)
        for kx in range(kw):
            shift_ref[ci * kw + kx] = padded[:, kx:kx + w]        # (H+2p, W)

    # ---- kh x kw, 2-in / 1-out conv: 98 MACs, row-offset-only reads --------
    acc = jnp.zeros((h, w), f32)
    for ci in range(2):
        for kx in range(kw):
            p = ci * kw + kx
            for ky in range(kh):
                coef = w_ref[ci * kh * kw + ky * kw + kx]         # SMEM scalar
                acc = acc + coef * shift_ref[p, ky:ky + h, :]

    # ---- sigmoid epilogue: sigmoid(x) = 0.5*(1 + tanh(x/2)) ----------------
    # Single transcendental on the otherwise-idle EUP, no VALU divide,
    # full f32 precision.
    o_ref[...] = (0.5 * (jnp.tanh(0.5 * acc) + 1.0)).astype(o_ref.dtype)


# ------------------------------ op wrapper ----------------------------------

def _round_up(a, b):
    return (a + b - 1) // b * b


def spatial_attention(x_nchw, conv_weight):
    # x_nchw     : (N, C, H, W)   any float dtype (kept native; no f32 upcast here)
    # conv_weight: (1, 2, kh, kw) -- Conv2d(2, 1, k, padding=k//2, bias=False)
    n, c, h, w = x_nchw.shape
    _, cin2, kh, kw = conv_weight.shape
    assert cin2 == 2 and kh == kw
    pad = kh // 2
    hp = h + 2 * pad
    out_dtype = x_nchw.dtype

    w_flat = conv_weight.astype(jnp.float32).reshape(-1)      # (2*kh*kw,) -> SMEM

    kernel = functools.partial(_spatial_attention_kernel, kh=kh, kw=kw, pad=pad)

    # Explicit scoped-VMEM budget: double-buffered in/out blocks + shift scratch
    # (shapes rounded to the (8, 128) physical tiling), with headroom.
    itemsize = x_nchw.dtype.itemsize
    in_blk = c * _round_up(h, 8) * _round_up(w, 128) * itemsize
    out_blk = _round_up(h, 8) * _round_up(w, 128) * jnp.dtype(out_dtype).itemsize
    scratch = 2 * kw * _round_up(hp, 8) * _round_up(w, 128) * 4
    vmem_limit = int(min(max(2 * (in_blk + out_blk) + scratch + (4 << 20),
                             16 << 20), 64 << 20))

    cost = pl.CostEstimate(
        flops=n * (2 * c * h * w + 2 * 2 * kh * kw * h * w),
        transcendentals=n * h * w,
        bytes_accessed=(x_nchw.size * itemsize + w_flat.size * 4
                        + n * h * w * jnp.dtype(out_dtype).itemsize),
    )

    return pl.pallas_call(
        kernel,
        out_shape=jax.ShapeDtypeStruct((n, 1, h, w), out_dtype),
        grid=(n,),
        in_specs=[
            pl.BlockSpec((None, c, h, w), lambda i: (i, 0, 0, 0)),
            pl.BlockSpec(memory_space=pltpu.MemorySpace.SMEM),
        ],
        out_specs=pl.BlockSpec((None, None, h, w), lambda i: (i, 0, 0, 0)),
        scratch_shapes=[
            pltpu.VMEM((2 * kw, hp, w), jnp.float32),
        ],
        compiler_params=pltpu.CompilerParams(
            dimension_semantics=("parallel",),
            vmem_limit_bytes=vmem_limit),
        cost_estimate=cost,
    )(x_nchw, w_flat)


# ------------------------------ reference -----------------------------------

def _ref_forward(x_nchw, conv_weight):
    x = x_nchw.astype(jnp.float32)
    avg = jnp.mean(x, axis=1, keepdims=True)
    mx = jnp.max(x, axis=1, keepdims=True)
    feat = jnp.concatenate([avg, mx], axis=1)                 # (N, 2, H, W)
    y = jax.lax.conv_general_dilated(
        feat, conv_weight.astype(jnp.float32),
        window_strides=(1, 1), padding="SAME",
        dimension_numbers=("NCHW", "OIHW", "NCHW"))
    return jax.nn.sigmoid(y)


# --------------------------------- main --------------------------------------

if __name__ == "__main__":
    key = jax.random.PRNGKey(0)
    k_x, k_w = jax.random.split(key)

    N, C, H, W = 2, 4, 16, 16
    K = 7
    x = jax.random.normal(k_x, (N, C, H, W), jnp.float32)
    conv_w = jax.random.normal(k_w, (1, 2, K, K), jnp.float32) / np.sqrt(2.0 * K * K)

    out = jax.block_until_ready(spatial_attention(x, conv_w))
    assert out.shape == (N, 1, H, W), out.shape

    ref = jax.block_until_ready(_ref_forward(x, conv_w))
    np.testing.assert_allclose(np.asarray(out), np.asarray(ref), atol=1e-5, rtol=1e-5)

    print("KERNEL_OK")
</pallas_src>

<mosaic_0001>
module attributes {stable_mosaic.version = 11 : i64} {
  func.func @_spatial_attention_kernel(%arg0: i32, %arg1: memref<1x4x16x16xf32, #tpu.memory_space<vmem>>, %arg2: memref<98xf32, #tpu.memory_space<smem>>, %arg3: memref<1x1x16x16xf32, #tpu.memory_space<vmem>>, %arg4: memref<14x22x16xf32, #tpu.memory_space<vmem>>) attributes {dimension_semantics = [#tpu.dimension_semantics<parallel>], iteration_bounds = array<i64: 2>, scalar_prefetch = 0 : i64, scratch_operands = 1 : i64, tpu.core_type = #tpu.core_type<tc>, window_params = [{transform_indices = @transform_0, window_bounds = array<i64: 1, 4, 16, 16>}, {transform_indices = @transform_1, window_bounds = array<i64: 98>}, {transform_indices = @transform_2, window_bounds = array<i64: 1, 1, 16, 16>}]} {
    %cst = arith.constant 0.000000e+00 : f32
    %0 = vector.broadcast %cst : f32 to vector<16x16xf32>
    %cst_0 = arith.constant 0xFF800000 : f32
    %1 = vector.broadcast %cst_0 : f32 to vector<16x16xf32>
    %c0_i32 = arith.constant 0 : i32
    %c0 = arith.constant 0 : index
    %2 = arith.index_cast %c0_i32 : i32 to index
    %c0_1 = arith.constant 0 : index
    %c0_2 = arith.constant 0 : index
    %3 = vector.load %arg1[%c0, %2, %c0_1, %c0_2] : memref<1x4x16x16xf32, #tpu.memory_space<vmem>>, vector<1x1x16x16xf32>
    %4 = vector.shape_cast %3 : vector<1x1x16x16xf32> to vector<16x16xf32>
    %5 = arith.addf %0, %4 : vector<16x16xf32>
    %6 = arith.maximumf %1, %4 : vector<16x16xf32>
    %c1_i32 = arith.constant 1 : i32
    %c0_3 = arith.constant 0 : index
    %7 = arith.index_cast %c1_i32 : i32 to index
    %c0_4 = arith.constant 0 : index
    %c0_5 = arith.constant 0 : index
    %8 = vector.load %arg1[%c0_3, %7, %c0_4, %c0_5] : memref<1x4x16x16xf32, #tpu.memory_space<vmem>>, vector<1x1x16x16xf32>
    %9 = vector.shape_cast %8 : vector<1x1x16x16xf32> to vector<16x16xf32>
    %10 = arith.addf %5, %9 : vector<16x16xf32>
    %11 = arith.maximumf %6, %9 : vector<16x16xf32>
    %c2_i32 = arith.constant 2 : i32
    %c0_6 = arith.constant 0 : index
    %12 = arith.index_cast %c2_i32 : i32 to index
    %c0_7 = arith.constant 0 : index
    %c0_8 = arith.constant 0 : index
    %13 = vector.load %arg1[%c0_6, %12, %c0_7, %c0_8] : memref<1x4x16x16xf32, #tpu.memory_space<vmem>>, vector<1x1x16x16xf32>
    %14 = vector.shape_cast %13 : vector<1x1x16x16xf32> to vector<16x16xf32>
    %15 = arith.addf %10, %14 : vector<16x16xf32>
    %16 = arith.maximumf %11, %14 : vector<16x16xf32>
    %c3_i32 = arith.constant 3 : i32
    %c0_9 = arith.constant 0 : index
    %17 = arith.index_cast %c3_i32 : i32 to index
    %c0_10 = arith.constant 0 : index
    %c0_11 = arith.constant 0 : index
    %18 = vector.load %arg1[%c0_9, %17, %c0_10, %c0_11] : memref<1x4x16x16xf32, #tpu.memory_space<vmem>>, vector<1x1x16x16xf32>
    %19 = vector.shape_cast %18 : vector<1x1x16x16xf32> to vector<16x16xf32>
    %20 = arith.addf %15, %19 : vector<16x16xf32>
    %21 = arith.maximumf %16, %19 : vector<16x16xf32>
    %c4_i32 = arith.constant 4 : i32
    %cst_12 = arith.constant 2.500000e-01 : f32
    %22 = vector.broadcast %cst_12 : f32 to vector<16x16xf32>
    %23 = arith.mulf %20, %22 : vector<16x16xf32>
    %cst_13 = arith.constant 0.000000e+00 : f32
    %24 = vector.broadcast %cst_13 : f32 to vector<3x22xf32>
    %cst_14 = arith.constant 0.000000e+00 : f32
    %25 = vector.broadcast %cst_14 : f32 to vector<16x3xf32>
    %26 = tpu.concatenate %25, %23, %25 in 1 : vector<16x3xf32>, vector<16x16xf32>, vector<16x3xf32> -> vector<16x22xf32>
    %27 = tpu.concatenate %24, %26, %24 in 0 : vector<3x22xf32>, vector<16x22xf32>, vector<3x22xf32> -> vector<22x22xf32>
    %28 = vector.extract_strided_slice %27 {offsets = [0, 0], sizes = [22, 16], strides = [1, 1]} : vector<22x22xf32> to vector<22x16xf32>
    %c0_15 = arith.constant 0 : index
    %c0_16 = arith.constant 0 : index
    %c0_17 = arith.constant 0 : index
    %29 = vector.load %arg4[%c0_15, %c0_16, %c0_17] : memref<14x22x16xf32, #tpu.memory_space<vmem>>, vector<1x22x16xf32>
    %30 = vector.shape_cast %29 : vector<1x22x16xf32> to vector<22x16xf32>
    %31 = vector.shape_cast %28 : vector<22x16xf32> to vector<1x22x16xf32>
    tpu.vector_store %arg4[%c0_15, %c0_16, %c0_17], %31 {strides = array<i32>} : memref<14x22x16xf32, #tpu.memory_space<vmem>>, vector<1x22x16xf32>,
    %32 = vector.extract_strided_slice %27 {offsets = [0, 1], sizes = [22, 16], strides = [1, 1]} : vector<22x22xf32> to vector<22x16xf32>
    %c1 = arith.constant 1 : index
    %c0_18 = arith.constant 0 : index
    %c0_19 = arith.constant 0 : index
    %33 = vector.load %arg4[%c1, %c0_18, %c0_19] : memref<14x22x16xf32, #tpu.memory_space<vmem>>, vector<1x22x16xf32>
    %34 = vector.shape_cast %33 : vector<1x22x16xf32> to vector<22x16xf32>
    %35 = vector.shape_cast %32 : vector<22x16xf32> to vector<1x22x16xf32>
    tpu.vector_store %arg4[%c1, %c0_18, %c0_19], %35 {strides = array<i32>} : memref<14x22x16xf32, #tpu.memory_space<vmem>>, vector<1x22x16xf32>,
    %36 = vector.extract_strided_slice %27 {offsets = [0, 2], sizes = [22, 16], strides = [1, 1]} : vector<22x22xf32> to vector<22x16xf32>
    %c2 = arith.constant 2 : index
    %c0_20 = arith.constant 0 : index
    %c0_21 = arith.constant 0 : index
    %37 = vector.load %arg4[%c2, %c0_20, %c0_21] : memref<14x22x16xf32, #tpu.memory_space<vmem>>, vector<1x22x16xf32>
    %38 = vector.shape_cast %37 : vector<1x22x16xf32> to vector<22x16xf32>
    %39 = vector.shape_cast %36 : vector<22x16xf32> to vector<1x22x16xf32>
    tpu.vector_store %arg4[%c2, %c0_20, %c0_21], %39 {strides = array<i32>} : memref<14x22x16xf32, #tpu.memory_space<vmem>>, vector<1x22x16xf32>,
    %40 = vector.extract_strided_slice %27 {offsets = [0, 3], sizes = [22, 16], strides = [1, 1]} : vector<22x22xf32> to vector<22x16xf32>
    %c3 = arith.constant 3 : index
    %c0_22 = arith.constant 0 : index
    %c0_23 = arith.constant 0 : index
    %41 = vector.load %arg4[%c3, %c0_22, %c0_23] : memref<14x22x16xf32, #tpu.memory_space<vmem>>, vector<1x22x16xf32>
    %42 = vector.shape_cast %41 : vector<1x22x16xf32> to vector<22x16xf32>
    %43 = vector.shape_cast %40 : vector<22x16xf32> to vector<1x22x16xf32>
    tpu.vector_store %arg4[%c3, %c0_22, %c0_23], %43 {strides = array<i32>} : memref<14x22x16xf32, #tpu.memory_space<vmem>>, vector<1x22x16xf32>,
    %44 = vector.extract_strided_slice %27 {offsets = [0, 4], sizes = [22, 16], strides = [1, 1]} : vector<22x22xf32> to vector<22x16xf32>
    %c4 = arith.constant 4 : index
    %c0_24 = arith.constant 0 : index
    %c0_25 = arith.constant 0 : index
    %45 = vector.load %arg4[%c4, %c0_24, %c0_25] : memref<14x22x16xf32, #tpu.memory_space<vmem>>, vector<1x22x16xf32>
    %46 = vector.shape_cast %45 : vector<1x22x16xf32> to vector<22x16xf32>
    %47 = vector.shape_cast %44 : vector<22x16xf32> to vector<1x22x16xf32>
    tpu.vector_store %arg4[%c4, %c0_24, %c0_25], %47 {strides = array<i32>} : memref<14x22x16xf32, #tpu.memory_space<vmem>>, vector<1x22x16xf32>,
    %48 = vector.extract_strided_slice %27 {offsets = [0, 5], sizes = [22, 16], strides = [1, 1]} : vector<22x22xf32> to vector<22x16xf32>
    %c5 = arith.constant 5 : index
    %c0_26 = arith.constant 0 : index
    %c0_27 = arith.constant 0 : index
    %49 = vector.load %arg4[%c5, %c0_26, %c0_27] : memref<14x22x16xf32, #tpu.memory_space<vmem>>, vector<1x22x16xf32>
    %50 = vector.shape_cast %49 : vector<1x22x16xf32> to vector<22x16xf32>
    %51 = vector.shape_cast %48 : vector<22x16xf32> to vector<1x22x16xf32>
    tpu.vector_store %arg4[%c5, %c0_26, %c0_27], %51 {strides = array<i32>} : memref<14x22x16xf32, #tpu.memory_space<vmem>>, vector<1x22x16xf32>,
    %52 = vector.extract_strided_slice %27 {offsets = [0, 6], sizes = [22, 16], strides = [1, 1]} : vector<22x22xf32> to vector<22x16xf32>
    %c6 = arith.constant 6 : index
    %c0_28 = arith.constant 0 : index
    %c0_29 = arith.constant 0 : index
    %53 = vector.load %arg4[%c6, %c0_28, %c0_29] : memref<14x22x16xf32, #tpu.memory_space<vmem>>, vector<1x22x16xf32>
    %54 = vector.shape_cast %53 : vector<1x22x16xf32> to vector<22x16xf32>
    %55 = vector.shape_cast %52 : vector<22x16xf32> to vector<1x22x16xf32>
    tpu.vector_store %arg4[%c6, %c0_28, %c0_29], %55 {strides = array<i32>} : memref<14x22x16xf32, #tpu.memory_space<vmem>>, vector<1x22x16xf32>,
    %56 = tpu.concatenate %25, %21, %25 in 1 : vector<16x3xf32>, vector<16x16xf32>, vector<16x3xf32> -> vector<16x22xf32>
    %57 = tpu.concatenate %24, %56, %24 in 0 : vector<3x22xf32>, vector<16x22xf32>, vector<3x22xf32> -> vector<22x22xf32>
    %58 = vector.extract_strided_slice %57 {offsets = [0, 0], sizes = [22, 16], strides = [1, 1]} : vector<22x22xf32> to vector<22x16xf32>
    %c7 = arith.constant 7 : index
    %c0_30 = arith.constant 0 : index
    %c0_31 = arith.constant 0 : index
    %59 = vector.load %arg4[%c7, %c0_30, %c0_31] : memref<14x22x16xf32, #tpu.memory_space<vmem>>, vector<1x22x16xf32>
    %60 = vector.shape_cast %59 : vector<1x22x16xf32> to vector<22x16xf32>
    %61 = vector.shape_cast %58 : vector<22x16xf32> to vector<1x22x16xf32>
    tpu.vector_store %arg4[%c7, %c0_30, %c0_31], %61 {strides = array<i32>} : memref<14x22x16xf32, #tpu.memory_space<vmem>>, vector<1x22x16xf32>,
    %62 = vector.extract_strided_slice %57 {offsets = [0, 1], sizes = [22, 16], strides = [1, 1]} : vector<22x22xf32> to vector<22x16xf32>
    %c8 = arith.constant 8 : index
    %c0_32 = arith.constant 0 : index
    %c0_33 = arith.constant 0 : index
    %63 = vector.load %arg4[%c8, %c0_32, %c0_33] : memref<14x22x16xf32, #tpu.memory_space<vmem>>, vector<1x22x16xf32>
    %64 = vector.shape_cast %63 : vector<1x22x16xf32> to vector<22x16xf32>
    %65 = vector.shape_cast %62 : vector<22x16xf32> to vector<1x22x16xf32>
    tpu.vector_store %arg4[%c8, %c0_32, %c0_33], %65 {strides = array<i32>} : memref<14x22x16xf32, #tpu.memory_space<vmem>>, vector<1x22x16xf32>,
    %66 = vector.extract_strided_slice %57 {offsets = [0, 2], sizes = [22, 16], strides = [1, 1]} : vector<22x22xf32> to vector<22x16xf32>
    %c9 = arith.constant 9 : index
    %c0_34 = arith.constant 0 : index
    %c0_35 = arith.constant 0 : index
    %67 = vector.load %arg4[%c9, %c0_34, %c0_35] : memref<14x22x16xf32, #tpu.memory_space<vmem>>, vector<1x22x16xf32>
    %68 = vector.shape_cast %67 : vector<1x22x16xf32> to vector<22x16xf32>
    %69 = vector.shape_cast %66 : vector<22x16xf32> to vector<1x22x16xf32>
    tpu.vector_store %arg4[%c9, %c0_34, %c0_35], %69 {strides = array<i32>} : memref<14x22x16xf32, #tpu.memory_space<vmem>>, vector<1x22x16xf32>,
    %70 = vector.extract_strided_slice %57 {offsets = [0, 3], sizes = [22, 16], strides = [1, 1]} : vector<22x22xf32> to vector<22x16xf32>
    %c10 = arith.constant 10 : index
    %c0_36 = arith.constant 0 : index
    %c0_37 = arith.constant 0 : index
    %71 = vector.load %arg4[%c10, %c0_36, %c0_37] : memref<14x22x16xf32, #tpu.memory_space<vmem>>, vector<1x22x16xf32>
    %72 = vector.shape_cast %71 : vector<1x22x16xf32> to vector<22x16xf32>
    %73 = vector.shape_cast %70 : vector<22x16xf32> to vector<1x22x16xf32>
    tpu.vector_store %arg4[%c10, %c0_36, %c0_37], %73 {strides = array<i32>} : memref<14x22x16xf32, #tpu.memory_space<vmem>>, vector<1x22x16xf32>,
    %74 = vector.extract_strided_slice %57 {offsets = [0, 4], sizes = [22, 16], strides = [1, 1]} : vector<22x22xf32> to vector<22x16xf32>
    %c11 = arith.constant 11 : index
    %c0_38 = arith.constant 0 : index
    %c0_39 = arith.constant 0 : index
    %75 = vector.load %arg4[%c11, %c0_38, %c0_39] : memref<14x22x16xf32, #tpu.memory_space<vmem>>, vector<1x22x16xf32>
    %76 = vector.shape_cast %75 : vector<1x22x16xf32> to vector<22x16xf32>
    %77 = vector.shape_cast %74 : vector<22x16xf32> to vector<1x22x16xf32>
    tpu.vector_store %arg4[%c11, %c0_38, %c0_39], %77 {strides = array<i32>} : memref<14x22x16xf32, #tpu.memory_space<vmem>>, vector<1x22x16xf32>,
    %78 = vector.extract_strided_slice %57 {offsets = [0, 5], sizes = [22, 16], strides = [1, 1]} : vector<22x22xf32> to vector<22x16xf32>
    %c12 = arith.constant 12 : index
    %c0_40 = arith.constant 0 : index
    %c0_41 = arith.constant 0 : index
    %79 = vector.load %arg4[%c12, %c0_40, %c0_41] : memref<14x22x16xf32, #tpu.memory_space<vmem>>, vector<1x22x16xf32>
    %80 = vector.shape_cast %79 : vector<1x22x16xf32> to vector<22x16xf32>
    %81 = vector.shape_cast %78 : vector<22x16xf32> to vector<1x22x16xf32>
    tpu.vector_store %arg4[%c12, %c0_40, %c0_41], %81 {strides = array<i32>} : memref<14x22x16xf32, #tpu.memory_space<vmem>>, vector<1x22x16xf32>,
    %82 = vector.extract_strided_slice %57 {offsets = [0, 6], sizes = [22, 16], strides = [1, 1]} : vector<22x22xf32> to vector<22x16xf32>
    %c13 = arith.constant 13 : index
    %c0_42 = arith.constant 0 : index
    %c0_43 = arith.constant 0 : index
    %83 = vector.load %arg4[%c13, %c0_42, %c0_43] : memref<14x22x16xf32, #tpu.memory_space<vmem>>, vector<1x22x16xf32>
    %84 = vector.shape_cast %83 : vector<1x22x16xf32> to vector<22x16xf32>
    %85 = vector.shape_cast %82 : vector<22x16xf32> to vector<1x22x16xf32>
    tpu.vector_store %arg4[%c13, %c0_42, %c0_43], %85 {strides = array<i32>} : memref<14x22x16xf32, #tpu.memory_space<vmem>>, vector<1x22x16xf32>,
    %cst_44 = arith.constant 0.000000e+00 : f32
    %86 = vector.broadcast %cst_44 : f32 to vector<16x16xf32>
    %c0_45 = arith.constant 0 : index
    %87 = memref.load %arg2[%c0_45] : memref<98xf32, #tpu.memory_space<smem>>
    %c0_46 = arith.constant 0 : index
    %c0_47 = arith.constant 0 : index
    %c0_48 = arith.constant 0 : index
    %88 = vector.load %arg4[%c0_46, %c0_47, %c0_48] : memref<14x22x16xf32, #tpu.memory_space<vmem>>, vector<1x16x16xf32>
    %89 = vector.shape_cast %88 : vector<1x16x16xf32> to vector<16x16xf32>
    %90 = vector.broadcast %87 : f32 to vector<16x16xf32>
    %91 = arith.mulf %90, %89 : vector<16x16xf32>
    %92 = arith.addf %86, %91 : vector<16x16xf32>
    %c7_49 = arith.constant 7 : index
    %93 = memref.load %arg2[%c7_49] : memref<98xf32, #tpu.memory_space<smem>>
    %c0_50 = arith.constant 0 : index
    %c1_51 = arith.constant 1 : index
    %c0_52 = arith.constant 0 : index
    %94 = vector.load %arg4[%c0_50, %c1_51, %c0_52] : memref<14x22x16xf32, #tpu.memory_space<vmem>>, vector<1x16x16xf32>
    %95 = vector.shape_cast %94 : vector<1x16x16xf32> to vector<16x16xf32>
    %96 = vector.broadcast %93 : f32 to vector<16x16xf32>
    %97 = arith.mulf %96, %95 : vector<16x16xf32>
    %98 = arith.addf %92, %97 : vector<16x16xf32>
    %c14 = arith.constant 14 : index
    %99 = memref.load %arg2[%c14] : memref<98xf32, #tpu.memory_space<smem>>
    %c0_53 = arith.constant 0 : index
    %c2_54 = arith.constant 2 : index
    %c0_55 = arith.constant 0 : index
    %100 = vector.load %arg4[%c0_53, %c2_54, %c0_55] : memref<14x22x16xf32, #tpu.memory_space<vmem>>, vector<1x16x16xf32>
    %101 = vector.shape_cast %100 : vector<1x16x16xf32> to vector<16x16xf32>
    %102 = vector.broadcast %99 : f32 to vector<16x16xf32>
    %103 = arith.mulf %102, %101 : vector<16x16xf32>
    %104 = arith.addf %98, %103 : vector<16x16xf32>
    %c21 = arith.constant 21 : index
    %105 = memref.load %arg2[%c21] : memref<98xf32, #tpu.memory_space<smem>>
    %c0_56 = arith.constant 0 : index
    %c3_57 = arith.constant 3 : index
    %c0_58 = arith.constant 0 : index
    %106 = vector.load %arg4[%c0_56, %c3_57, %c0_58] : memref<14x22x16xf32, #tpu.memory_space<vmem>>, vector<1x16x16xf32>
    %107 = vector.shape_cast %106 : vector<1x16x16xf32> to vector<16x16xf32>
    %108 = vector.broadcast %105 : f32 to vector<16x16xf32>
    %109 = arith.mulf %108, %107 : vector<16x16xf32>
    %110 = arith.addf %104, %109 : vector<16x16xf32>
    %c28 = arith.constant 28 : index
    %111 = memref.load %arg2[%c28] : memref<98xf32, #tpu.memory_space<smem>>
    %c0_59 = arith.constant 0 : index
    %c4_60 = arith.constant 4 : index
    %c0_61 = arith.constant 0 : index
    %112 = vector.load %arg4[%c0_59, %c4_60, %c0_61] : memref<14x22x16xf32, #tpu.memory_space<vmem>>, vector<1x16x16xf32>
    %113 = vector.shape_cast %112 : vector<1x16x16xf32> to vector<16x16xf32>
    %114 = vector.broadcast %111 : f32 to vector<16x16xf32>
    %115 = arith.mulf %114, %113 : vector<16x16xf32>
    %116 = arith.addf %110, %115 : vector<16x16xf32>
    %c35 = arith.constant 35 : index
    %117 = memref.load %arg2[%c35] : memref<98xf32, #tpu.memory_space<smem>>
    %c0_62 = arith.constant 0 : index
    %c5_63 = arith.constant 5 : index
    %c0_64 = arith.constant 0 : index
    %118 = vector.load %arg4[%c0_62, %c5_63, %c0_64] : memref<14x22x16xf32, #tpu.memory_space<vmem>>, vector<1x16x16xf32>
    %119 = vector.shape_cast %118 : vector<1x16x16xf32> to vector<16x16xf32>
    %120 = vector.broadcast %117 : f32 to vector<16x16xf32>
    %121 = arith.mulf %120, %119 : vector<16x16xf32>
    %122 = arith.addf %116, %121 : vector<16x16xf32>
    %c42 = arith.constant 42 : index
    %123 = memref.load %arg2[%c42] : memref<98xf32, #tpu.memory_space<smem>>
    %c0_65 = arith.constant 0 : index
    %c6_66 = arith.constant 6 : index
    %c0_67 = arith.constant 0 : index
    %124 = vector.load %arg4[%c0_65, %c6_66, %c0_67] : memref<14x22x16xf32, #tpu.memory_space<vmem>>, vector<1x16x16xf32>
    %125 = vector.shape_cast %124 : vector<1x16x16xf32> to vector<16x16xf32>
    %126 = vector.broadcast %123 : f32 to vector<16x16xf32>
    %127 = arith.mulf %126, %125 : vector<16x16xf32>
    %128 = arith.addf %122, %127 : vector<16x16xf32>
    %c1_68 = arith.constant 1 : index
    %129 = memref.load %arg2[%c1_68] : memref<98xf32, #tpu.memory_space<smem>>
    %c1_69 = arith.constant 1 : index
    %c0_70 = arith.constant 0 : index
    %c0_71 = arith.constant 0 : index
    %130 = vector.load %arg4[%c1_69, %c0_70, %c0_71] : memref<14x22x16xf32, #tpu.memory_space<vmem>>, vector<1x16x16xf32>
    %131 = vector.shape_cast %130 : vector<1x16x16xf32> to vector<16x16xf32>
    %132 = vector.broadcast %129 : f32 to vector<16x16xf32>
    %133 = arith.mulf %132, %131 : vector<16x16xf32>
    %134 = arith.addf %128, %133 : vector<16x16xf32>
    %c8_72 = arith.constant 8 : index
    %135 = memref.load %arg2[%c8_72] : memref<98xf32, #tpu.memory_space<smem>>
    %c1_73 = arith.constant 1 : index
    %c1_74 = arith.constant 1 : index
    %c0_75 = arith.constant 0 : index
    %136 = vector.load %arg4[%c1_73, %c1_74, %c0_75] : memref<14x22x16xf32, #tpu.memory_space<vmem>>, vector<1x16x16xf32>
    %137 = vector.shape_cast %136 : vector<1x16x16xf32> to vector<16x16xf32>
    %138 = vector.broadcast %135 : f32 to vector<16x16xf32>
    %139 = arith.mulf %138, %137 : vector<16x16xf32>
    %140 = arith.addf %134, %139 : vector<16x16xf32>
    %c15 = arith.constant 15 : index
    %141 = memref.load %arg2[%c15] : memref<98xf32, #tpu.memory_space<smem>>
    %c1_76 = arith.constant 1 : index
    %c2_77 = arith.constant 2 : index
    %c0_78 = arith.constant 0 : index
    %142 = vector.load %arg4[%c1_76, %c2_77, %c0_78] : memref<14x22x16xf32, #tpu.memory_space<vmem>>, vector<1x16x16xf32>
    %143 = vector.shape_cast %142 : vector<1x16x16xf32> to vector<16x16xf32>
    %144 = vector.broadcast %141 : f32 to vector<16x16xf32>
    %145 = arith.mulf %144, %143 : vector<16x16xf32>
    %146 = arith.addf %140, %145 : vector<16x16xf32>
    %c22 = arith.constant 22 : index
    %147 = memref.load %arg2[%c22] : memref<98xf32, #tpu.memory_space<smem>>
    %c1_79 = arith.constant 1 : index
    %c3_80 = arith.constant 3 : index
    %c0_81 = arith.constant 0 : index
    %148 = vector.load %arg4[%c1_79, %c3_80, %c0_81] : memref<14x22x16xf32, #tpu.memory_space<vmem>>, vector<1x16x16xf32>
    %149 = vector.shape_cast %148 : vector<1x16x16xf32> to vector<16x16xf32>
    %150 = vector.broadcast %147 : f32 to vector<16x16xf32>
    %151 = arith.mulf %150, %149 : vector<16x16xf32>
    %152 = arith.addf %146, %151 : vector<16x16xf32>
    %c29 = arith.constant 29 : index
    %153 = memref.load %arg2[%c29] : memref<98xf32, #tpu.memory_space<smem>>
    %c1_82 = arith.constant 1 : index
    %c4_83 = arith.constant 4 : index
    %c0_84 = arith.constant 0 : index
    %154 = vector.load %arg4[%c1_82, %c4_83, %c0_84] : memref<14x22x16xf32, #tpu.memory_space<vmem>>, vector<1x16x16xf32>
    %155 = vector.shape_cast %154 : vector<1x16x16xf32> to vector<16x16xf32>
    %156 = vector.broadcast %153 : f32 to vector<16x16xf32>
    %157 = arith.mulf %156, %155 : vector<16x16xf32>
    %158 = arith.addf %152, %157 : vector<16x16xf32>
    %c36 = arith.constant 36 : index
    %159 = memref.load %arg2[%c36] : memref<98xf32, #tpu.memory_space<smem>>
    %c1_85 = arith.constant 1 : index
    %c5_86 = arith.constant 5 : index
    %c0_87 = arith.constant 0 : index
    %160 = vector.load %arg4[%c1_85, %c5_86, %c0_87] : memref<14x22x16xf32, #tpu.memory_space<vmem>>, vector<1x16x16xf32>
    %161 = vector.shape_cast %160 : vector<1x16x16xf32> to vector<16x16xf32>
    %162 = vector.broadcast %159 : f32 to vector<16x16xf32>
    %163 = arith.mulf %162, %161 : vector<16x16xf32>
    %164 = arith.addf %158, %163 : vector<16x16xf32>
    %c43 = arith.constant 43 : index
    %165 = memref.load %arg2[%c43] : memref<98xf32, #tpu.memory_space<smem>>
    %c1_88 = arith.constant 1 : index
    %c6_89 = arith.constant 6 : index
    %c0_90 = arith.constant 0 : index
    %166 = vector.load %arg4[%c1_88, %c6_89, %c0_90] : memref<14x22x16xf32, #tpu.memory_space<vmem>>, vector<1x16x16xf32>
    %167 = vector.shape_cast %166 : vector<1x16x16xf32> to vector<16x16xf32>
    %168 = vector.broadcast %165 : f32 to vector<16x16xf32>
    %169 = arith.mulf %168, %167 : vector<16x16xf32>
    %170 = arith.addf %164, %169 : vector<16x16xf32>
    %c2_91 = arith.constant 2 : index
    %171 = memref.load %arg2[%c2_91] : memref<98xf32, #tpu.memory_space<smem>>
    %c2_92 = arith.constant 2 : index
    %c0_93 = arith.constant 0 : index
    %c0_94 = arith.constant 0 : index
    %172 = vector.load %arg4[%c2_92, %c0_93, %c0_94] : memref<14x22x16xf32, #tpu.memory_space<vmem>>, vector<1x16x16xf32>
    %173 = vector.shape_cast %172 : vector<1x16x16xf32> to vector<16x16xf32>
    %174 = vector.broadcast %171 : f32 to vector<16x16xf32>
    %175 = arith.mulf %174, %173 : vector<16x16xf32>
    %176 = arith.addf %170, %175 : vector<16x16xf32>
    %c9_95 = arith.constant 9 : index
    %177 = memref.load %arg2[%c9_95] : memref<98xf32, #tpu.memory_space<smem>>
    %c2_96 = arith.constant 2 : index
    %c1_97 = arith.constant 1 : index
    %c0_98 = arith.constant 0 : index
    %178 = vector.load %arg4[%c2_96, %c1_97, %c0_98] : memref<14x22x16xf32, #tpu.memory_space<vmem>>, vector<1x16x16xf32>
    %179 = vector.shape_cast %178 : vector<1x16x16xf32> to vector<16x16xf32>
    %180 = vector.broadcast %177 : f32 to vector<16x16xf32>
    %181 = arith.mulf %180, %179 : vector<16x16xf32>
    %182 = arith.addf %176, %181 : vector<16x16xf32>
    %c16 = arith.constant 16 : index
    %183 = memref.load %arg2[%c16] : memref<98xf32, #tpu.memory_space<smem>>
    %c2_99 = arith.constant 2 : index
    %c2_100 = arith.constant 2 : index
    %c0_101 = arith.constant 0 : index
    %184 = vector.load %arg4[%c2_99, %c2_100, %c0_101] : memref<14x22x16xf32, #tpu.memory_space<vmem>>, vector<1x16x16xf32>
    %185 = vector.shape_cast %184 : vector<1x16x16xf32> to vector<16x16xf32>
    %186 = vector.broadcast %183 : f32 to vector<16x16xf32>
    %187 = arith.mulf %186, %185 : vector<16x16xf32>
    %188 = arith.addf %182, %187 : vector<16x16xf32>
    %c23 = arith.constant 23 : index
    %189 = memref.load %arg2[%c23] : memref<98xf32, #tpu.memory_space<smem>>
    %c2_102 = arith.constant 2 : index
    %c3_103 = arith.constant 3 : index
    %c0_104 = arith.constant 0 : index
    %190 = vector.load %arg4[%c2_102, %c3_103, %c0_104] : memref<14x22x16xf32, #tpu.memory_space<vmem>>, vector<1x16x16xf32>
    %191 = vector.shape_cast %190 : vector<1x16x16xf32> to vector<16x16xf32>
    %192 = vector.broadcast %189 : f32 to vector<16x16xf32>
    %193 = arith.mulf %192, %191 : vector<16x16xf32>
    %194 = arith.addf %188, %193 : vector<16x16xf32>
    %c30 = arith.constant 30 : index
    %195 = memref.load %arg2[%c30] : memref<98xf32, #tpu.memory_space<smem>>
    %c2_105 = arith.constant 2 : index
    %c4_106 = arith.constant 4 : index
    %c0_107 = arith.constant 0 : index
    %196 = vector.load %arg4[%c2_105, %c4_106, %c0_107] : memref<14x22x16xf32, #tpu.memory_space<vmem>>, vector<1x16x16xf32>
    %197 = vector.shape_cast %196 : vector<1x16x16xf32> to vector<16x16xf32>
    %198 = vector.broadcast %195 : f32 to vector<16x16xf32>
    %199 = arith.mulf %198, %197 : vector<16x16xf32>
    %200 = arith.addf %194, %199 : vector<16x16xf32>
    %c37 = arith.constant 37 : index
    %201 = memref.load %arg2[%c37] : memref<98xf32, #tpu.memory_space<smem>>
    %c2_108 = arith.constant 2 : index
    %c5_109 = arith.constant 5 : index
    %c0_110 = arith.constant 0 : index
    %202 = vector.load %arg4[%c2_108, %c5_109, %c0_110] : memref<14x22x16xf32, #tpu.memory_space<vmem>>, vector<1x16x16xf32>
    %203 = vector.shape_cast %202 : vector<1x16x16xf32> to vector<16x16xf32>
    %204 = vector.broadcast %201 : f32 to vector<16x16xf32>
    %205 = arith.mulf %204, %203 : vector<16x16xf32>
    %206 = arith.addf %200, %205 : vector<16x16xf32>
    %c44 = arith.constant 44 : index
    %207 = memref.load %arg2[%c44] : memref<98xf32, #tpu.memory_space<smem>>
    %c2_111 = arith.constant 2 : index
    %c6_112 = arith.constant 6 : index
    %c0_113 = arith.constant 0 : index
    %208 = vector.load %arg4[%c2_111, %c6_112, %c0_113] : memref<14x22x16xf32, #tpu.memory_space<vmem>>, vector<1x16x16xf32>
    %209 = vector.shape_cast %208 : vector<1x16x16xf32> to vector<16x16xf32>
    %210 = vector.broadcast %207 : f32 to vector<16x16xf32>
    %211 = arith.mulf %210, %209 : vector<16x16xf32>
    %212 = arith.addf %206, %211 : vector<16x16xf32>
    %c3_114 = arith.constant 3 : index
    %213 = memref.load %arg2[%c3_114] : memref<98xf32, #tpu.memory_space<smem>>
    %c3_115 = arith.constant 3 : index
    %c0_116 = arith.constant 0 : index
    %c0_117 = arith.constant 0 : index
    %214 = vector.load %arg4[%c3_115, %c0_116, %c0_117] : memref<14x22x16xf32, #tpu.memory_space<vmem>>, vector<1x16x16xf32>
    %215 = vector.shape_cast %214 : vector<1x16x16xf32> to vector<16x16xf32>
    %216 = vector.broadcast %213 : f32 to vector<16x16xf32>
    %217 = arith.mulf %216, %215 : vector<16x16xf32>
    %218 = arith.addf %212, %217 : vector<16x16xf32>
    %c10_118 = arith.constant 10 : index
    %219 = memref.load %arg2[%c10_118] : memref<98xf32, #tpu.memory_space<smem>>
    %c3_119 = arith.constant 3 : index
    %c1_120 = arith.constant 1 : index
    %c0_121 = arith.constant 0 : index
    %220 = vector.load %arg4[%c3_119, %c1_120, %c0_121] : memref<14x22x16xf32, #tpu.memory_space<vmem>>, vector<1x16x16xf32>
    %221 = vector.shape_cast %220 : vector<1x16x16xf32> to vector<16x16xf32>
    %222 = vector.broadcast %219 : f32 to vector<16x16xf32>
    %223 = arith.mulf %222, %221 : vector<16x16xf32>
    %224 = arith.addf %218, %223 : vector<16x16xf32>
    %c17 = arith.constant 17 : index
    %225 = memref.load %arg2[%c17] : memref<98xf32, #tpu.memory_space<smem>>
    %c3_122 = arith.constant 3 : index
    %c2_123 = arith.constant 2 : index
    %c0_124 = arith.constant 0 : index
    %226 = vector.load %arg4[%c3_122, %c2_123, %c0_124] : memref<14x22x16xf32, #tpu.memory_space<vmem>>, vector<1x16x16xf32>
    %227 = vector.shape_cast %226 : vector<1x16x16xf32> to vector<16x16xf32>
    %228 = vector.broadcast %225 : f32 to vector<16x16xf32>
    %229 = arith.mulf %228, %227 : vector<16x16xf32>
    %230 = arith.addf %224, %229 : vector<16x16xf32>
    %c24 = arith.constant 24 : index
    %231 = memref.load %arg2[%c24] : memref<98xf32, #tpu.memory_space<smem>>
    %c3_125 = arith.constant 3 : index
    %c3_126 = arith.constant 3 : index
    %c0_127 = arith.constant 0 : index
    %232 = vector.load %arg4[%c3_125, %c3_126, %c0_127] : memref<14x22x16xf32, #tpu.memory_space<vmem>>, vector<1x16x16xf32>
    %233 = vector.shape_cast %232 : vector<1x16x16xf32> to vector<16x16xf32>
    %234 = vector.broadcast %231 : f32 to vector<16x16xf32>
    %235 = arith.mulf %234, %233 : vector<16x16xf32>
    %236 = arith.addf %230, %235 : vector<16x16xf32>
    %c31 = arith.constant 31 : index
    %237 = memref.load %arg2[%c31] : memref<98xf32, #tpu.memory_space<smem>>
    %c3_128 = arith.constant 3 : index
    %c4_129 = arith.constant 4 : index
    %c0_130 = arith.constant 0 : index
    %238 = vector.load %arg4[%c3_128, %c4_129, %c0_130] : memref<14x22x16xf32, #tpu.memory_space<vmem>>, vector<1x16x16xf32>
    %239 = vector.shape_cast %238 : vector<1x16x16xf32> to vector<16x16xf32>
    %240 = vector.broadcast %237 : f32 to vector<16x16xf32>
    %241 = arith.mulf %240, %239 : vector<16x16xf32>
    %242 = arith.addf %236, %241 : vector<16x16xf32>
    %c38 = arith.constant 38 : index
    %243 = memref.load %arg2[%c38] : memref<98xf32, #tpu.memory_space<smem>>
    %c3_131 = arith.constant 3 : index
    %c5_132 = arith.constant 5 : index
    %c0_133 = arith.constant 0 : index
    %244 = vector.load %arg4[%c3_131, %c5_132, %c0_133] : memref<14x22x16xf32, #tpu.memory_space<vmem>>, vector<1x16x16xf32>
    %245 = vector.shape_cast %244 : vector<1x16x16xf32> to vector<16x16xf32>
    %246 = vector.broadcast %243 : f32 to vector<16x16xf32>
    %247 = arith.mulf %246, %245 : vector<16x16xf32>
    %248 = arith.addf %242, %247 : vector<16x16xf32>
    %c45 = arith.constant 45 : index
    %249 = memref.load %arg2[%c45] : memref<98xf32, #tpu.memory_space<smem>>
    %c3_134 = arith.constant 3 : index
    %c6_135 = arith.constant 6 : index
    %c0_136 = arith.constant 0 : index
    %250 = vector.load %arg4[%c3_134, %c6_135, %c0_136] : memref<14x22x16xf32, #tpu.memory_space<vmem>>, vector<1x16x16xf32>
    %251 = vector.shape_cast %250 : vector<1x16x16xf32> to vector<16x16xf32>
    %252 = vector.broadcast %249 : f32 to vector<16x16xf32>
    %253 = arith.mulf %252, %251 : vector<16x16xf32>
    %254 = arith.addf %248, %253 : vector<16x16xf32>
    %c4_137 = arith.constant 4 : index
    %255 = memref.load %arg2[%c4_137] : memref<98xf32, #tpu.memory_space<smem>>
    %c4_138 = arith.constant 4 : index
    %c0_139 = arith.constant 0 : index
    %c0_140 = arith.constant 0 : index
    %256 = vector.load %arg4[%c4_138, %c0_139, %c0_140] : memref<14x22x16xf32, #tpu.memory_space<vmem>>, vector<1x16x16xf32>
    %257 = vector.shape_cast %256 : vector<1x16x16xf32> to vector<16x16xf32>
    %258 = vector.broadcast %255 : f32 to vector<16x16xf32>
    %259 = arith.mulf %258, %257 : vector<16x16xf32>
    %260 = arith.addf %254, %259 : vector<16x16xf32>
    %c11_141 = arith.constant 11 : index
    %261 = memref.load %arg2[%c11_141] : memref<98xf32, #tpu.memory_space<smem>>
    %c4_142 = arith.constant 4 : index
    %c1_143 = arith.constant 1 : index
    %c0_144 = arith.constant 0 : index
    %262 = vector.load %arg4[%c4_142, %c1_143, %c0_144] : memref<14x22x16xf32, #tpu.memory_space<vmem>>, vector<1x16x16xf32>
    %263 = vector.shape_cast %262 : vector<1x16x16xf32> to vector<16x16xf32>
    %264 = vector.broadcast %261 : f32 to vector<16x16xf32>
    %265 = arith.mulf %264, %263 : vector<16x16xf32>
    %266 = arith.addf %260, %265 : vector<16x16xf32>
    %c18 = arith.constant 18 : index
    %267 = memref.load %arg2[%c18] : memref<98xf32, #tpu.memory_space<smem>>
    %c4_145 = arith.constant 4 : index
    %c2_146 = arith.constant 2 : index
    %c0_147 = arith.constant 0 : index
    %268 = vector.load %arg4[%c4_145, %c2_146, %c0_147] : memref<14x22x16xf32, #tpu.memory_space<vmem>>, vector<1x16x16xf32>
    %269 = vector.shape_cast %268 : vector<1x16x16xf32> to vector<16x16xf32>
    %270 = vector.broadcast %267 : f32 to vector<16x16xf32>
    %271 = arith.mulf %270, %269 : vector<16x16xf32>
    %272 = arith.addf %266, %271 : vector<16x16xf32>
    %c25 = arith.constant 25 : index
    %273 = memref.load %arg2[%c25] : memref<98xf32, #tpu.memory_space<smem>>
    %c4_148 = arith.constant 4 : index
    %c3_149 = arith.constant 3 : index
    %c0_150 = arith.constant 0 : index
    %274 = vector.load %arg4[%c4_148, %c3_149, %c0_150] : memref<14x22x16xf32, #tpu.memory_space<vmem>>, vector<1x16x16xf32>
    %275 = vector.shape_cast %274 : vector<1x16x16xf32> to vector<16x16xf32>
    %276 = vector.broadcast %273 : f32 to vector<16x16xf32>
    %277 = arith.mulf %276, %275 : vector<16x16xf32>
    %278 = arith.addf %272, %277 : vector<16x16xf32>
    %c32 = arith.constant 32 : index
    %279 = memref.load %arg2[%c32] : memref<98xf32, #tpu.memory_space<smem>>
    %c4_151 = arith.constant 4 : index
    %c4_152 = arith.constant 4 : index
    %c0_153 = arith.constant 0 : index
    %280 = vector.load %arg4[%c4_151, %c4_152, %c0_153] : memref<14x22x16xf32, #tpu.memory_space<vmem>>, vector<1x16x16xf32>
    %281 = vector.shape_cast %280 : vector<1x16x16xf32> to vector<16x16xf32>
    %282 = vector.broadcast %279 : f32 to vector<16x16xf32>
    %283 = arith.mulf %282, %281 : vector<16x16xf32>
    %284 = arith.addf %278, %283 : vector<16x16xf32>
    %c39 = arith.constant 39 : index
    %285 = memref.load %arg2[%c39] : memref<98xf32, #tpu.memory_space<smem>>
    %c4_154 = arith.constant 4 : index
    %c5_155 = arith.constant 5 : index
    %c0_156 = arith.constant 0 : index
    %286 = vector.load %arg4[%c4_154, %c5_155, %c0_156] : memref<14x22x16xf32, #tpu.memory_space<vmem>>, vector<1x16x16xf32>
    %287 = vector.shape_cast %286 : vector<1x16x16xf32> to vector<16x16xf32>
    %288 = vector.broadcast %285 : f32 to vector<16x16xf32>
    %289 = arith.mulf %288, %287 : vector<16x16xf32>
    %290 = arith.addf %284, %289 : vector<16x16xf32>
    %c46 = arith.constant 46 : index
    %291 = memref.load %arg2[%c46] : memref<98xf32, #tpu.memory_space<smem>>
    %c4_157 = arith.constant 4 : index
    %c6_158 = arith.constant 6 : index
    %c0_159 = arith.constant 0 : index
    %292 = vector.load %arg4[%c4_157, %c6_158, %c0_159] : memref<14x22x16xf32, #tpu.memory_space<vmem>>, vector<1x16x16xf32>
    %293 = vector.shape_cast %292 : vector<1x16x16xf32> to vector<16x16xf32>
    %294 = vector.broadcast %291 : f32 to vector<16x16xf32>
    %295 = arith.mulf %294, %293 : vector<16x16xf32>
    %296 = arith.addf %290, %295 : vector<16x16xf32>
    %c5_160 = arith.constant 5 : index
    %297 = memref.load %arg2[%c5_160] : memref<98xf32, #tpu.memory_space<smem>>
    %c5_161 = arith.constant 5 : index
    %c0_162 = arith.constant 0 : index
    %c0_163 = arith.constant 0 : index
    %298 = vector.load %arg4[%c5_161, %c0_162, %c0_163] : memref<14x22x16xf32, #tpu.memory_space<vmem>>, vector<1x16x16xf32>
    %299 = vector.shape_cast %298 : vector<1x16x16xf32> to vector<16x16xf32>
    %300 = vector.broadcast %297 : f32 to vector<16x16xf32>
    %301 = arith.mulf %300, %299 : vector<16x16xf32>
    %302 = arith.addf %296, %301 : vector<16x16xf32>
    %c12_164 = arith.constant 12 : index
    %303 = memref.load %arg2[%c12_164] : memref<98xf32, #tpu.memory_space<smem>>
    %c5_165 = arith.constant 5 : index
    %c1_166 = arith.constant 1 : index
    %c0_167 = arith.constant 0 : index
    %304 = vector.load %arg4[%c5_165, %c1_166, %c0_167] : memref<14x22x16xf32, #tpu.memory_space<vmem>>, vector<1x16x16xf32>
    %305 = vector.shape_cast %304 : vector<1x16x16xf32> to vector<16x16xf32>
    %306 = vector.broadcast %303 : f32 to vector<16x16xf32>
    %307 = arith.mulf %306, %305 : vector<16x16xf32>
    %308 = arith.addf %302, %307 : vector<16x16xf32>
    %c19 = arith.constant 19 : index
    %309 = memref.load %arg2[%c19] : memref<98xf32, #tpu.memory_space<smem>>
    %c5_168 = arith.constant 5 : index
    %c2_169 = arith.constant 2 : index
    %c0_170 = arith.constant 0 : index
    %310 = vector.load %arg4[%c5_168, %c2_169, %c0_170] : memref<14x22x16xf32, #tpu.memory_space<vmem>>, vector<1x16x16xf32>
    %311 = vector.shape_cast %310 : vector<1x16x16xf32> to vector<16x16xf32>
    %312 = vector.broadcast %309 : f32 to vector<16x16xf32>
    %313 = arith.mulf %312, %311 : vector<16x16xf32>
    %314 = arith.addf %308, %313 : vector<16x16xf32>
    %c26 = arith.constant 26 : index
    %315 = memref.load %arg2[%c26] : memref<98xf32, #tpu.memory_space<smem>>
    %c5_171 = arith.constant 5 : index
    %c3_172 = arith.constant 3 : index
    %c0_173 = arith.constant 0 : index
    %316 = vector.load %arg4[%c5_171, %c3_172, %c0_173] : memref<14x22x16xf32, #tpu.memory_space<vmem>>, vector<1x16x16xf32>
    %317 = vector.shape_cast %316 : vector<1x16x16xf32> to vector<16x16xf32>
    %318 = vector.broadcast %315 : f32 to vector<16x16xf32>
    %319 = arith.mulf %318, %317 : vector<16x16xf32>
    %320 = arith.addf %314, %319 : vector<16x16xf32>
    %c33 = arith.constant 33 : index
    %321 = memref.load %arg2[%c33] : memref<98xf32, #tpu.memory_space<smem>>
    %c5_174 = arith.constant 5 : index
    %c4_175 = arith.constant 4 : index
    %c0_176 = arith.constant 0 : index
    %322 = vector.load %arg4[%c5_174, %c4_175, %c0_176] : memref<14x22x16xf32, #tpu.memory_space<vmem>>, vector<1x16x16xf32>
    %323 = vector.shape_cast %322 : vector<1x16x16xf32> to vector<16x16xf32>
    %324 = vector.broadcast %321 : f32 to vector<16x16xf32>
    %325 = arith.mulf %324, %323 : vector<16x16xf32>
    %326 = arith.addf %320, %325 : vector<16x16xf32>
    %c40 = arith.constant 40 : index
    %327 = memref.load %arg2[%c40] : memref<98xf32, #tpu.memory_space<smem>>
    %c5_177 = arith.constant 5 : index
    %c5_178 = arith.constant 5 : index
    %c0_179 = arith.constant 0 : index
    %328 = vector.load %arg4[%c5_177, %c5_178, %c0_179] : memref<14x22x16xf32, #tpu.memory_space<vmem>>, vector<1x16x16xf32>
    %329 = vector.shape_cast %328 : vector<1x16x16xf32> to vector<16x16xf32>
    %330 = vector.broadcast %327 : f32 to vector<16x16xf32>
    %331 = arith.mulf %330, %329 : vector<16x16xf32>
    %332 = arith.addf %326, %331 : vector<16x16xf32>
    %c47 = arith.constant 47 : index
    %333 = memref.load %arg2[%c47] : memref<98xf32, #tpu.memory_space<smem>>
    %c5_180 = arith.constant 5 : index
    %c6_181 = arith.constant 6 : index
    %c0_182 = arith.constant 0 : index
    %334 = vector.load %arg4[%c5_180, %c6_181, %c0_182] : memref<14x22x16xf32, #tpu.memory_space<vmem>>, vector<1x16x16xf32>
    %335 = vector.shape_cast %334 : vector<1x16x16xf32> to vector<16x16xf32>
    %336 = vector.broadcast %333 : f32 to vector<16x16xf32>
    %337 = arith.mulf %336, %335 : vector<16x16xf32>
    %338 = arith.addf %332, %337 : vector<16x16xf32>
    %c6_183 = arith.constant 6 : index
    %339 = memref.load %arg2[%c6_183] : memref<98xf32, #tpu.memory_space<smem>>
    %c6_184 = arith.constant 6 : index
    %c0_185 = arith.constant 0 : index
    %c0_186 = arith.constant 0 : index
    %340 = vector.load %arg4[%c6_184, %c0_185, %c0_186] : memref<14x22x16xf32, #tpu.memory_space<vmem>>, vector<1x16x16xf32>
    %341 = vector.shape_cast %340 : vector<1x16x16xf32> to vector<16x16xf32>
    %342 = vector.broadcast %339 : f32 to vector<16x16xf32>
    %343 = arith.mulf %342, %341 : vector<16x16xf32>
    %344 = arith.addf %338, %343 : vector<16x16xf32>
    %c13_187 = arith.constant 13 : index
    %345 = memref.load %arg2[%c13_187] : memref<98xf32, #tpu.memory_space<smem>>
    %c6_188 = arith.constant 6 : index
    %c1_189 = arith.constant 1 : index
    %c0_190 = arith.constant 0 : index
    %346 = vector.load %arg4[%c6_188, %c1_189, %c0_190] : memref<14x22x16xf32, #tpu.memory_space<vmem>>, vector<1x16x16xf32>
    %347 = vector.shape_cast %346 : vector<1x16x16xf32> to vector<16x16xf32>
    %348 = vector.broadcast %345 : f32 to vector<16x16xf32>
    %349 = arith.mulf %348, %347 : vector<16x16xf32>
    %350 = arith.addf %344, %349 : vector<16x16xf32>
    %c20 = arith.constant 20 : index
    %351 = memref.load %arg2[%c20] : memref<98xf32, #tpu.memory_space<smem>>
    %c6_191 = arith.constant 6 : index
    %c2_192 = arith.constant 2 : index
    %c0_193 = arith.constant 0 : index
    %352 = vector.load %arg4[%c6_191, %c2_192, %c0_193] : memref<14x22x16xf32, #tpu.memory_space<vmem>>, vector<1x16x16xf32>
    %353 = vector.shape_cast %352 : vector<1x16x16xf32> to vector<16x16xf32>
    %354 = vector.broadcast %351 : f32 to vector<16x16xf32>
    %355 = arith.mulf %354, %353 : vector<16x16xf32>
    %356 = arith.addf %350, %355 : vector<16x16xf32>
    %c27 = arith.constant 27 : index
    %357 = memref.load %arg2[%c27] : memref<98xf32, #tpu.memory_space<smem>>
    %c6_194 = arith.constant 6 : index
    %c3_195 = arith.constant 3 : index
    %c0_196 = arith.constant 0 : index
    %358 = vector.load %arg4[%c6_194, %c3_195, %c0_196] : memref<14x22x16xf32, #tpu.memory_space<vmem>>, vector<1x16x16xf32>
    %359 = vector.shape_cast %358 : vector<1x16x16xf32> to vector<16x16xf32>
    %360 = vector.broadcast %357 : f32 to vector<16x16xf32>
    %361 = arith.mulf %360, %359 : vector<16x16xf32>
    %362 = arith.addf %356, %361 : vector<16x16xf32>
    %c34 = arith.constant 34 : index
    %363 = memref.load %arg2[%c34] : memref<98xf32, #tpu.memory_space<smem>>
    %c6_197 = arith.constant 6 : index
    %c4_198 = arith.constant 4 : index
    %c0_199 = arith.constant 0 : index
    %364 = vector.load %arg4[%c6_197, %c4_198, %c0_199] : memref<14x22x16xf32, #tpu.memory_space<vmem>>, vector<1x16x16xf32>
    %365 = vector.shape_cast %364 : vector<1x16x16xf32> to vector<16x16xf32>
    %366 = vector.broadcast %363 : f32 to vector<16x16xf32>
    %367 = arith.mulf %366, %365 : vector<16x16xf32>
    %368 = arith.addf %362, %367 : vector<16x16xf32>
    %c41 = arith.constant 41 : index
    %369 = memref.load %arg2[%c41] : memref<98xf32, #tpu.memory_space<smem>>
    %c6_200 = arith.constant 6 : index
    %c5_201 = arith.constant 5 : index
    %c0_202 = arith.constant 0 : index
    %370 = vector.load %arg4[%c6_200, %c5_201, %c0_202] : memref<14x22x16xf32, #tpu.memory_space<vmem>>, vector<1x16x16xf32>
    %371 = vector.shape_cast %370 : vector<1x16x16xf32> to vector<16x16xf32>
    %372 = vector.broadcast %369 : f32 to vector<16x16xf32>
    %373 = arith.mulf %372, %371 : vector<16x16xf32>
    %374 = arith.addf %368, %373 : vector<16x16xf32>
    %c48 = arith.constant 48 : index
    %375 = memref.load %arg2[%c48] : memref<98xf32, #tpu.memory_space<smem>>
    %c6_203 = arith.constant 6 : index
    %c6_204 = arith.constant 6 : index
    %c0_205 = arith.constant 0 : index
    %376 = vector.load %arg4[%c6_203, %c6_204, %c0_205] : memref<14x22x16xf32, #tpu.memory_space<vmem>>, vector<1x16x16xf32>
    %377 = vector.shape_cast %376 : vector<1x16x16xf32> to vector<16x16xf32>
    %378 = vector.broadcast %375 : f32 to vector<16x16xf32>
    %379 = arith.mulf %378, %377 : vector<16x16xf32>
    %380 = arith.addf %374, %379 : vector<16x16xf32>
    %c49 = arith.constant 49 : index
    %381 = memref.load %arg2[%c49] : memref<98xf32, #tpu.memory_space<smem>>
    %c7_206 = arith.constant 7 : index
    %c0_207 = arith.constant 0 : index
    %c0_208 = arith.constant 0 : index
    %382 = vector.load %arg4[%c7_206, %c0_207, %c0_208] : memref<14x22x16xf32, #tpu.memory_space<vmem>>, vector<1x16x16xf32>
    %383 = vector.shape_cast %382 : vector<1x16x16xf32> to vector<16x16xf32>
    %384 = vector.broadcast %381 : f32 to vector<16x16xf32>
    %385 = arith.mulf %384, %383 : vector<16x16xf32>
    %386 = arith.addf %380, %385 : vector<16x16xf32>
    %c56 = arith.constant 56 : index
    %387 = memref.load %arg2[%c56] : memref<98xf32, #tpu.memory_space<smem>>
    %c7_209 = arith.constant 7 : index
    %c1_210 = arith.constant 1 : index
    %c0_211 = arith.constant 0 : index
    %388 = vector.load %arg4[%c7_209, %c1_210, %c0_211] : memref<14x22x16xf32, #tpu.memory_space<vmem>>, vector<1x16x16xf32>
    %389 = vector.shape_cast %388 : vector<1x16x16xf32> to vector<16x16xf32>
    %390 = vector.broadcast %387 : f32 to vector<16x16xf32>
    %391 = arith.mulf %390, %389 : vector<16x16xf32>
    %392 = arith.addf %386, %391 : vector<16x16xf32>
    %c63 = arith.constant 63 : index
    %393 = memref.load %arg2[%c63] : memref<98xf32, #tpu.memory_space<smem>>
    %c7_212 = arith.constant 7 : index
    %c2_213 = arith.constant 2 : index
    %c0_214 = arith.constant 0 : index
    %394 = vector.load %arg4[%c7_212, %c2_213, %c0_214] : memref<14x22x16xf32, #tpu.memory_space<vmem>>, vector<1x16x16xf32>
    %395 = vector.shape_cast %394 : vector<1x16x16xf32> to vector<16x16xf32>
    %396 = vector.broadcast %393 : f32 to vector<16x16xf32>
    %397 = arith.mulf %396, %395 : vector<16x16xf32>
    %398 = arith.addf %392, %397 : vector<16x16xf32>
    %c70 = arith.constant 70 : index
    %399 = memref.load %arg2[%c70] : memref<98xf32, #tpu.memory_space<smem>>
    %c7_215 = arith.constant 7 : index
    %c3_216 = arith.constant 3 : index
    %c0_217 = arith.constant 0 : index
    %400 = vector.load %arg4[%c7_215, %c3_216, %c0_217] : memref<14x22x16xf32, #tpu.memory_space<vmem>>, vector<1x16x16xf32>
    %401 = vector.shape_cast %400 : vector<1x16x16xf32> to vector<16x16xf32>
    %402 = vector.broadcast %399 : f32 to vector<16x16xf32>
    %403 = arith.mulf %402, %401 : vector<16x16xf32>
    %404 = arith.addf %398, %403 : vector<16x16xf32>
    %c77 = arith.constant 77 : index
    %405 = memref.load %arg2[%c77] : memref<98xf32, #tpu.memory_space<smem>>
    %c7_218 = arith.constant 7 : index
    %c4_219 = arith.constant 4 : index
    %c0_220 = arith.constant 0 : index
    %406 = vector.load %arg4[%c7_218, %c4_219, %c0_220] : memref<14x22x16xf32, #tpu.memory_space<vmem>>, vector<1x16x16xf32>
    %407 = vector.shape_cast %406 : vector<1x16x16xf32> to vector<16x16xf32>
    %408 = vector.broadcast %405 : f32 to vector<16x16xf32>
    %409 = arith.mulf %408, %407 : vector<16x16xf32>
    %410 = arith.addf %404, %409 : vector<16x16xf32>
    %c84 = arith.constant 84 : index
    %411 = memref.load %arg2[%c84] : memref<98xf32, #tpu.memory_space<smem>>
    %c7_221 = arith.constant 7 : index
    %c5_222 = arith.constant 5 : index
    %c0_223 = arith.constant 0 : index
    %412 = vector.load %arg4[%c7_221, %c5_222, %c0_223] : memref<14x22x16xf32, #tpu.memory_space<vmem>>, vector<1x16x16xf32>
    %413 = vector.shape_cast %412 : vector<1x16x16xf32> to vector<16x16xf32>
    %414 = vector.broadcast %411 : f32 to vector<16x16xf32>
    %415 = arith.mulf %414, %413 : vector<16x16xf32>
    %416 = arith.addf %410, %415 : vector<16x16xf32>
    %c91 = arith.constant 91 : index
    %417 = memref.load %arg2[%c91] : memref<98xf32, #tpu.memory_space<smem>>
    %c7_224 = arith.constant 7 : index
    %c6_225 = arith.constant 6 : index
    %c0_226 = arith.constant 0 : index
    %418 = vector.load %arg4[%c7_224, %c6_225, %c0_226] : memref<14x22x16xf32, #tpu.memory_space<vmem>>, vector<1x16x16xf32>
    %419 = vector.shape_cast %418 : vector<1x16x16xf32> to vector<16x16xf32>
    %420 = vector.broadcast %417 : f32 to vector<16x16xf32>
    %421 = arith.mulf %420, %419 : vector<16x16xf32>
    %422 = arith.addf %416, %421 : vector<16x16xf32>
    %c50 = arith.constant 50 : index
    %423 = memref.load %arg2[%c50] : memref<98xf32, #tpu.memory_space<smem>>
    %c8_227 = arith.constant 8 : index
    %c0_228 = arith.constant 0 : index
    %c0_229 = arith.constant 0 : index
    %424 = vector.load %arg4[%c8_227, %c0_228, %c0_229] : memref<14x22x16xf32, #tpu.memory_space<vmem>>, vector<1x16x16xf32>
    %425 = vector.shape_cast %424 : vector<1x16x16xf32> to vector<16x16xf32>
    %426 = vector.broadcast %423 : f32 to vector<16x16xf32>
    %427 = arith.mulf %426, %425 : vector<16x16xf32>
    %428 = arith.addf %422, %427 : vector<16x16xf32>
    %c57 = arith.constant 57 : index
    %429 = memref.load %arg2[%c57] : memref<98xf32, #tpu.memory_space<smem>>
    %c8_230 = arith.constant 8 : index
    %c1_231 = arith.constant 1 : index
    %c0_232 = arith.constant 0 : index
    %430 = vector.load %arg4[%c8_230, %c1_231, %c0_232] : memref<14x22x16xf32, #tpu.memory_space<vmem>>, vector<1x16x16xf32>
    %431 = vector.shape_cast %430 : vector<1x16x16xf32> to vector<16x16xf32>
    %432 = vector.broadcast %429 : f32 to vector<16x16xf32>
    %433 = arith.mulf %432, %431 : vector<16x16xf32>
    %434 = arith.addf %428, %433 : vector<16x16xf32>
    %c64 = arith.constant 64 : index
    %435 = memref.load %arg2[%c64] : memref<98xf32, #tpu.memory_space<smem>>
    %c8_233 = arith.constant 8 : index
    %c2_234 = arith.constant 2 : index
    %c0_235 = arith.constant 0 : index
    %436 = vector.load %arg4[%c8_233, %c2_234, %c0_235] : memref<14x22x16xf32, #tpu.memory_space<vmem>>, vector<1x16x16xf32>
    %437 = vector.shape_cast %436 : vector<1x16x16xf32> to vector<16x16xf32>
    %438 = vector.broadcast %435 : f32 to vector<16x16xf32>
    %439 = arith.mulf %438, %437 : vector<16x16xf32>
    %440 = arith.addf %434, %439 : vector<16x16xf32>
    %c71 = arith.constant 71 : index
    %441 = memref.load %arg2[%c71] : memref<98xf32, #tpu.memory_space<smem>>
    %c8_236 = arith.constant 8 : index
    %c3_237 = arith.constant 3 : index
    %c0_238 = arith.constant 0 : index
    %442 = vector.load %arg4[%c8_236, %c3_237, %c0_238] : memref<14x22x16xf32, #tpu.memory_space<vmem>>, vector<1x16x16xf32>
    %443 = vector.shape_cast %442 : vector<1x16x16xf32> to vector<16x16xf32>
    %444 = vector.broadcast %441 : f32 to vector<16x16xf32>
    %445 = arith.mulf %444, %443 : vector<16x16xf32>
    %446 = arith.addf %440, %445 : vector<16x16xf32>
    %c78 = arith.constant 78 : index
    %447 = memref.load %arg2[%c78] : memref<98xf32, #tpu.memory_space<smem>>
    %c8_239 = arith.constant 8 : index
    %c4_240 = arith.constant 4 : index
    %c0_241 = arith.constant 0 : index
    %448 = vector.load %arg4[%c8_239, %c4_240, %c0_241] : memref<14x22x16xf32, #tpu.memory_space<vmem>>, vector<1x16x16xf32>
    %449 = vector.shape_cast %448 : vector<1x16x16xf32> to vector<16x16xf32>
    %450 = vector.broadcast %447 : f32 to vector<16x16xf32>
    %451 = arith.mulf %450, %449 : vector<16x16xf32>
    %452 = arith.addf %446, %451 : vector<16x16xf32>
    %c85 = arith.constant 85 : index
    %453 = memref.load %arg2[%c85] : memref<98xf32, #tpu.memory_space<smem>>
    %c8_242 = arith.constant 8 : index
    %c5_243 = arith.constant 5 : index
    %c0_244 = arith.constant 0 : index
    %454 = vector.load %arg4[%c8_242, %c5_243, %c0_244] : memref<14x22x16xf32, #tpu.memory_space<vmem>>, vector<1x16x16xf32>
    %455 = vector.shape_cast %454 : vector<1x16x16xf32> to vector<16x16xf32>
    %456 = vector.broadcast %453 : f32 to vector<16x16xf32>
    %457 = arith.mulf %456, %455 : vector<16x16xf32>
    %458 = arith.addf %452, %457 : vector<16x16xf32>
    %c92 = arith.constant 92 : index
    %459 = memref.load %arg2[%c92] : memref<98xf32, #tpu.memory_space<smem>>
    %c8_245 = arith.constant 8 : index
    %c6_246 = arith.constant 6 : index
    %c0_247 = arith.constant 0 : index
    %460 = vector.load %arg4[%c8_245, %c6_246, %c0_247] : memref<14x22x16xf32, #tpu.memory_space<vmem>>, vector<1x16x16xf32>
    %461 = vector.shape_cast %460 : vector<1x16x16xf32> to vector<16x16xf32>
    %462 = vector.broadcast %459 : f32 to vector<16x16xf32>
    %463 = arith.mulf %462, %461 : vector<16x16xf32>
    %464 = arith.addf %458, %463 : vector<16x16xf32>
    %c51 = arith.constant 51 : index
    %465 = memref.load %arg2[%c51] : memref<98xf32, #tpu.memory_space<smem>>
    %c9_248 = arith.constant 9 : index
    %c0_249 = arith.constant 0 : index
    %c0_250 = arith.constant 0 : index
    %466 = vector.load %arg4[%c9_248, %c0_249, %c0_250] : memref<14x22x16xf32, #tpu.memory_space<vmem>>, vector<1x16x16xf32>
    %467 = vector.shape_cast %466 : vector<1x16x16xf32> to vector<16x16xf32>
    %468 = vector.broadcast %465 : f32 to vector<16x16xf32>
    %469 = arith.mulf %468, %467 : vector<16x16xf32>
    %470 = arith.addf %464, %469 : vector<16x16xf32>
    %c58 = arith.constant 58 : index
    %471 = memref.load %arg2[%c58] : memref<98xf32, #tpu.memory_space<smem>>
    %c9_251 = arith.constant 9 : index
    %c1_252 = arith.constant 1 : index
    %c0_253 = arith.constant 0 : index
    %472 = vector.load %arg4[%c9_251, %c1_252, %c0_253] : memref<14x22x16xf32, #tpu.memory_space<vmem>>, vector<1x16x16xf32>
    %473 = vector.shape_cast %472 : vector<1x16x16xf32> to vector<16x16xf32>
    %474 = vector.broadcast %471 : f32 to vector<16x16xf32>
    %475 = arith.mulf %474, %473 : vector<16x16xf32>
    %476 = arith.addf %470, %475 : vector<16x16xf32>
    %c65 = arith.constant 65 : index
    %477 = memref.load %arg2[%c65] : memref<98xf32, #tpu.memory_space<smem>>
    %c9_254 = arith.constant 9 : index
    %c2_255 = arith.constant 2 : index
    %c0_256 = arith.constant 0 : index
    %478 = vector.load %arg4[%c9_254, %c2_255, %c0_256] : memref<14x22x16xf32, #tpu.memory_space<vmem>>, vector<1x16x16xf32>
    %479 = vector.shape_cast %478 : vector<1x16x16xf32> to vector<16x16xf32>
    %480 = vector.broadcast %477 : f32 to vector<16x16xf32>
    %481 = arith.mulf %480, %479 : vector<16x16xf32>
    %482 = arith.addf %476, %481 : vector<16x16xf32>
    %c72 = arith.constant 72 : index
    %483 = memref.load %arg2[%c72] : memref<98xf32, #tpu.memory_space<smem>>
    %c9_257 = arith.constant 9 : index
    %c3_258 = arith.constant 3 : index
    %c0_259 = arith.constant 0 : index
    %484 = vector.load %arg4[%c9_257, %c3_258, %c0_259] : memref<14x22x16xf32, #tpu.memory_space<vmem>>, vector<1x16x16xf32>
    %485 = vector.shape_cast %484 : vector<1x16x16xf32> to vector<16x16xf32>
    %486 = vector.broadcast %483 : f32 to vector<16x16xf32>
    %487 = arith.mulf %486, %485 : vector<16x16xf32>
    %488 = arith.addf %482, %487 : vector<16x16xf32>
    %c79 = arith.constant 79 : index
    %489 = memref.load %arg2[%c79] : memref<98xf32, #tpu.memory_space<smem>>
    %c9_260 = arith.constant 9 : index
    %c4_261 = arith.constant 4 : index
    %c0_262 = arith.constant 0 : index
    %490 = vector.load %arg4[%c9_260, %c4_261, %c0_262] : memref<14x22x16xf32, #tpu.memory_space<vmem>>, vector<1x16x16xf32>
    %491 = vector.shape_cast %490 : vector<1x16x16xf32> to vector<16x16xf32>
    %492 = vector.broadcast %489 : f32 to vector<16x16xf32>
    %493 = arith.mulf %492, %491 : vector<16x16xf32>
    %494 = arith.addf %488, %493 : vector<16x16xf32>
    %c86 = arith.constant 86 : index
    %495 = memref.load %arg2[%c86] : memref<98xf32, #tpu.memory_space<smem>>
    %c9_263 = arith.constant 9 : index
    %c5_264 = arith.constant 5 : index
    %c0_265 = arith.constant 0 : index
    %496 = vector.load %arg4[%c9_263, %c5_264, %c0_265] : memref<14x22x16xf32, #tpu.memory_space<vmem>>, vector<1x16x16xf32>
    %497 = vector.shape_cast %496 : vector<1x16x16xf32> to vector<16x16xf32>
    %498 = vector.broadcast %495 : f32 to vector<16x16xf32>
    %499 = arith.mulf %498, %497 : vector<16x16xf32>
    %500 = arith.addf %494, %499 : vector<16x16xf32>
    %c93 = arith.constant 93 : index
    %501 = memref.load %arg2[%c93] : memref<98xf32, #tpu.memory_space<smem>>
    %c9_266 = arith.constant 9 : index
    %c6_267 = arith.constant 6 : index
    %c0_268 = arith.constant 0 : index
    %502 = vector.load %arg4[%c9_266, %c6_267, %c0_268] : memref<14x22x16xf32, #tpu.memory_space<vmem>>, vector<1x16x16xf32>
    %503 = vector.shape_cast %502 : vector<1x16x16xf32> to vector<16x16xf32>
    %504 = vector.broadcast %501 : f32 to vector<16x16xf32>
    %505 = arith.mulf %504, %503 : vector<16x16xf32>
    %506 = arith.addf %500, %505 : vector<16x16xf32>
    %c52 = arith.constant 52 : index
    %507 = memref.load %arg2[%c52] : memref<98xf32, #tpu.memory_space<smem>>
    %c10_269 = arith.constant 10 : index
    %c0_270 = arith.constant 0 : index
    %c0_271 = arith.constant 0 : index
    %508 = vector.load %arg4[%c10_269, %c0_270, %c0_271] : memref<14x22x16xf32, #tpu.memory_space<vmem>>, vector<1x16x16xf32>
    %509 = vector.shape_cast %508 : vector<1x16x16xf32> to vector<16x16xf32>
    %510 = vector.broadcast %507 : f32 to vector<16x16xf32>
    %511 = arith.mulf %510, %509 : vector<16x16xf32>
    %512 = arith.addf %506, %511 : vector<16x16xf32>
    %c59 = arith.constant 59 : index
    %513 = memref.load %arg2[%c59] : memref<98xf32, #tpu.memory_space<smem>>
    %c10_272 = arith.constant 10 : index
    %c1_273 = arith.constant 1 : index
    %c0_274 = arith.constant 0 : index
    %514 = vector.load %arg4[%c10_272, %c1_273, %c0_274] : memref<14x22x16xf32, #tpu.memory_space<vmem>>, vector<1x16x16xf32>
    %515 = vector.shape_cast %514 : vector<1x16x16xf32> to vector<16x16xf32>
    %516 = vector.broadcast %513 : f32 to vector<16x16xf32>
    %517 = arith.mulf %516, %515 : vector<16x16xf32>
    %518 = arith.addf %512, %517 : vector<16x16xf32>
    %c66 = arith.constant 66 : index
    %519 = memref.load %arg2[%c66] : memref<98xf32, #tpu.memory_space<smem>>
    %c10_275 = arith.constant 10 : index
    %c2_276 = arith.constant 2 : index
    %c0_277 = arith.constant 0 : index
    %520 = vector.load %arg4[%c10_275, %c2_276, %c0_277] : memref<14x22x16xf32, #tpu.memory_space<vmem>>, vector<1x16x16xf32>
    %521 = vector.shape_cast %520 : vector<1x16x16xf32> to vector<16x16xf32>
    %522 = vector.broadcast %519 : f32 to vector<16x16xf32>
    %523 = arith.mulf %522, %521 : vector<16x16xf32>
    %524 = arith.addf %518, %523 : vector<16x16xf32>
    %c73 = arith.constant 73 : index
    %525 = memref.load %arg2[%c73] : memref<98xf32, #tpu.memory_space<smem>>
    %c10_278 = arith.constant 10 : index
    %c3_279 = arith.constant 3 : index
    %c0_280 = arith.constant 0 : index
    %526 = vector.load %arg4[%c10_278, %c3_279, %c0_280] : memref<14x22x16xf32, #tpu.memory_space<vmem>>, vector<1x16x16xf32>
    %527 = vector.shape_cast %526 : vector<1x16x16xf32> to vector<16x16xf32>
    %528 = vector.broadcast %525 : f32 to vector<16x16xf32>
    %529 = arith.mulf %528, %527 : vector<16x16xf32>
    %530 = arith.addf %524, %529 : vector<16x16xf32>
    %c80 = arith.constant 80 : index
    %531 = memref.load %arg2[%c80] : memref<98xf32, #tpu.memory_space<smem>>
    %c10_281 = arith.constant 10 : index
    %c4_282 = arith.constant 4 : index
    %c0_283 = arith.constant 0 : index
    %532 = vector.load %arg4[%c10_281, %c4_282, %c0_283] : memref<14x22x16xf32, #tpu.memory_space<vmem>>, vector<1x16x16xf32>
    %533 = vector.shape_cast %532 : vector<1x16x16xf32> to vector<16x16xf32>
    %534 = vector.broadcast %531 : f32 to vector<16x16xf32>
    %535 = arith.mulf %534, %533 : vector<16x16xf32>
    %536 = arith.addf %530, %535 : vector<16x16xf32>
    %c87 = arith.constant 87 : index
    %537 = memref.load %arg2[%c87] : memref<98xf32, #tpu.memory_space<smem>>
    %c10_284 = arith.constant 10 : index
    %c5_285 = arith.constant 5 : index
    %c0_286 = arith.constant 0 : index
    %538 = vector.load %arg4[%c10_284, %c5_285, %c0_286] : memref<14x22x16xf32, #tpu.memory_space<vmem>>, vector<1x16x16xf32>
    %539 = vector.shape_cast %538 : vector<1x16x16xf32> to vector<16x16xf32>
    %540 = vector.broadcast %537 : f32 to vector<16x16xf32>
    %541 = arith.mulf %540, %539 : vector<16x16xf32>
    %542 = arith.addf %536, %541 : vector<16x16xf32>
    %c94 = arith.constant 94 : index
    %543 = memref.load %arg2[%c94] : memref<98xf32, #tpu.memory_space<smem>>
    %c10_287 = arith.constant 10 : index
    %c6_288 = arith.constant 6 : index
    %c0_289 = arith.constant 0 : index
    %544 = vector.load %arg4[%c10_287, %c6_288, %c0_289] : memref<14x22x16xf32, #tpu.memory_space<vmem>>, vector<1x16x16xf32>
    %545 = vector.shape_cast %544 : vector<1x16x16xf32> to vector<16x16xf32>
    %546 = vector.broadcast %543 : f32 to vector<16x16xf32>
    %547 = arith.mulf %546, %545 : vector<16x16xf32>
    %548 = arith.addf %542, %547 : vector<16x16xf32>
    %c53 = arith.constant 53 : index
    %549 = memref.load %arg2[%c53] : memref<98xf32, #tpu.memory_space<smem>>
    %c11_290 = arith.constant 11 : index
    %c0_291 = arith.constant 0 : index
    %c0_292 = arith.constant 0 : index
    %550 = vector.load %arg4[%c11_290, %c0_291, %c0_292] : memref<14x22x16xf32, #tpu.memory_space<vmem>>, vector<1x16x16xf32>
    %551 = vector.shape_cast %550 : vector<1x16x16xf32> to vector<16x16xf32>
    %552 = vector.broadcast %549 : f32 to vector<16x16xf32>
    %553 = arith.mulf %552, %551 : vector<16x16xf32>
    %554 = arith.addf %548, %553 : vector<16x16xf32>
    %c60 = arith.constant 60 : index
    %555 = memref.load %arg2[%c60] : memref<98xf32, #tpu.memory_space<smem>>
    %c11_293 = arith.constant 11 : index
    %c1_294 = arith.constant 1 : index
    %c0_295 = arith.constant 0 : index
    %556 = vector.load %arg4[%c11_293, %c1_294, %c0_295] : memref<14x22x16xf32, #tpu.memory_space<vmem>>, vector<1x16x16xf32>
    %557 = vector.shape_cast %556 : vector<1x16x16xf32> to vector<16x16xf32>
    %558 = vector.broadcast %555 : f32 to vector<16x16xf32>
    %559 = arith.mulf %558, %557 : vector<16x16xf32>
    %560 = arith.addf %554, %559 : vector<16x16xf32>
    %c67 = arith.constant 67 : index
    %561 = memref.load %arg2[%c67] : memref<98xf32, #tpu.memory_space<smem>>
    %c11_296 = arith.constant 11 : index
    %c2_297 = arith.constant 2 : index
    %c0_298 = arith.constant 0 : index
    %562 = vector.load %arg4[%c11_296, %c2_297, %c0_298] : memref<14x22x16xf32, #tpu.memory_space<vmem>>, vector<1x16x16xf32>
    %563 = vector.shape_cast %562 : vector<1x16x16xf32> to vector<16x16xf32>
    %564 = vector.broadcast %561 : f32 to vector<16x16xf32>
    %565 = arith.mulf %564, %563 : vector<16x16xf32>
    %566 = arith.addf %560, %565 : vector<16x16xf32>
    %c74 = arith.constant 74 : index
    %567 = memref.load %arg2[%c74] : memref<98xf32, #tpu.memory_space<smem>>
    %c11_299 = arith.constant 11 : index
    %c3_300 = arith.constant 3 : index
    %c0_301 = arith.constant 0 : index
    %568 = vector.load %arg4[%c11_299, %c3_300, %c0_301] : memref<14x22x16xf32, #tpu.memory_space<vmem>>, vector<1x16x16xf32>
    %569 = vector.shape_cast %568 : vector<1x16x16xf32> to vector<16x16xf32>
    %570 = vector.broadcast %567 : f32 to vector<16x16xf32>
    %571 = arith.mulf %570, %569 : vector<16x16xf32>
    %572 = arith.addf %566, %571 : vector<16x16xf32>
    %c81 = arith.constant 81 : index
    %573 = memref.load %arg2[%c81] : memref<98xf32, #tpu.memory_space<smem>>
    %c11_302 = arith.constant 11 : index
    %c4_303 = arith.constant 4 : index
    %c0_304 = arith.constant 0 : index
    %574 = vector.load %arg4[%c11_302, %c4_303, %c0_304] : memref<14x22x16xf32, #tpu.memory_space<vmem>>, vector<1x16x16xf32>
    %575 = vector.shape_cast %574 : vector<1x16x16xf32> to vector<16x16xf32>
    %576 = vector.broadcast %573 : f32 to vector<16x16xf32>
    %577 = arith.mulf %576, %575 : vector<16x16xf32>
    %578 = arith.addf %572, %577 : vector<16x16xf32>
    %c88 = arith.constant 88 : index
    %579 = memref.load %arg2[%c88] : memref<98xf32, #tpu.memory_space<smem>>
    %c11_305 = arith.constant 11 : index
    %c5_306 = arith.constant 5 : index
    %c0_307 = arith.constant 0 : index
    %580 = vector.load %arg4[%c11_305, %c5_306, %c0_307] : memref<14x22x16xf32, #tpu.memory_space<vmem>>, vector<1x16x16xf32>
    %581 = vector.shape_cast %580 : vector<1x16x16xf32> to vector<16x16xf32>
    %582 = vector.broadcast %579 : f32 to vector<16x16xf32>
    %583 = arith.mulf %582, %581 : vector<16x16xf32>
    %584 = arith.addf %578, %583 : vector<16x16xf32>
    %c95 = arith.constant 95 : index
    %585 = memref.load %arg2[%c95] : memref<98xf32, #tpu.memory_space<smem>>
    %c11_308 = arith.constant 11 : index
    %c6_309 = arith.constant 6 : index
    %c0_310 = arith.constant 0 : index
    %586 = vector.load %arg4[%c11_308, %c6_309, %c0_310] : memref<14x22x16xf32, #tpu.memory_space<vmem>>, vector<1x16x16xf32>
    %587 = vector.shape_cast %586 : vector<1x16x16xf32> to vector<16x16xf32>
    %588 = vector.broadcast %585 : f32 to vector<16x16xf32>
    %589 = arith.mulf %588, %587 : vector<16x16xf32>
    %590 = arith.addf %584, %589 : vector<16x16xf32>
    %c54 = arith.constant 54 : index
    %591 = memref.load %arg2[%c54] : memref<98xf32, #tpu.memory_space<smem>>
    %c12_311 = arith.constant 12 : index
    %c0_312 = arith.constant 0 : index
    %c0_313 = arith.constant 0 : index
    %592 = vector.load %arg4[%c12_311, %c0_312, %c0_313] : memref<14x22x16xf32, #tpu.memory_space<vmem>>, vector<1x16x16xf32>
    %593 = vector.shape_cast %592 : vector<1x16x16xf32> to vector<16x16xf32>
    %594 = vector.broadcast %591 : f32 to vector<16x16xf32>
    %595 = arith.mulf %594, %593 : vector<16x16xf32>
    %596 = arith.addf %590, %595 : vector<16x16xf32>
    %c61 = arith.constant 61 : index
    %597 = memref.load %arg2[%c61] : memref<98xf32, #tpu.memory_space<smem>>
    %c12_314 = arith.constant 12 : index
    %c1_315 = arith.constant 1 : index
    %c0_316 = arith.constant 0 : index
    %598 = vector.load %arg4[%c12_314, %c1_315, %c0_316] : memref<14x22x16xf32, #tpu.memory_space<vmem>>, vector<1x16x16xf32>
    %599 = vector.shape_cast %598 : vector<1x16x16xf32> to vector<16x16xf32>
    %600 = vector.broadcast %597 : f32 to vector<16x16xf32>
    %601 = arith.mulf %600, %599 : vector<16x16xf32>
    %602 = arith.addf %596, %601 : vector<16x16xf32>
    %c68 = arith.constant 68 : index
    %603 = memref.load %arg2[%c68] : memref<98xf32, #tpu.memory_space<smem>>
    %c12_317 = arith.constant 12 : index
    %c2_318 = arith.constant 2 : index
    %c0_319 = arith.constant 0 : index
    %604 = vector.load %arg4[%c12_317, %c2_318, %c0_319] : memref<14x22x16xf32, #tpu.memory_space<vmem>>, vector<1x16x16xf32>
    %605 = vector.shape_cast %604 : vector<1x16x16xf32> to vector<16x16xf32>
    %606 = vector.broadcast %603 : f32 to vector<16x16xf32>
    %607 = arith.mulf %606, %605 : vector<16x16xf32>
    %608 = arith.addf %602, %607 : vector<16x16xf32>
    %c75 = arith.constant 75 : index
    %609 = memref.load %arg2[%c75] : memref<98xf32, #tpu.memory_space<smem>>
    %c12_320 = arith.constant 12 : index
    %c3_321 = arith.constant 3 : index
    %c0_322 = arith.constant 0 : index
    %610 = vector.load %arg4[%c12_320, %c3_321, %c0_322] : memref<14x22x16xf32, #tpu.memory_space<vmem>>, vector<1x16x16xf32>
    %611 = vector.shape_cast %610 : vector<1x16x16xf32> to vector<16x16xf32>
    %612 = vector.broadcast %609 : f32 to vector<16x16xf32>
    %613 = arith.mulf %612, %611 : vector<16x16xf32>
    %614 = arith.addf %608, %613 : vector<16x16xf32>
    %c82 = arith.constant 82 : index
    %615 = memref.load %arg2[%c82] : memref<98xf32, #tpu.memory_space<smem>>
    %c12_323 = arith.constant 12 : index
    %c4_324 = arith.constant 4 : index
    %c0_325 = arith.constant 0 : index
    %616 = vector.load %arg4[%c12_323, %c4_324, %c0_325] : memref<14x22x16xf32, #tpu.memory_space<vmem>>, vector<1x16x16xf32>
    %617 = vector.shape_cast %616 : vector<1x16x16xf32> to vector<16x16xf32>
    %618 = vector.broadcast %615 : f32 to vector<16x16xf32>
    %619 = arith.mulf %618, %617 : vector<16x16xf32>
    %620 = arith.addf %614, %619 : vector<16x16xf32>
    %c89 = arith.constant 89 : index
    %621 = memref.load %arg2[%c89] : memref<98xf32, #tpu.memory_space<smem>>
    %c12_326 = arith.constant 12 : index
    %c5_327 = arith.constant 5 : index
    %c0_328 = arith.constant 0 : index
    %622 = vector.load %arg4[%c12_326, %c5_327, %c0_328] : memref<14x22x16xf32, #tpu.memory_space<vmem>>, vector<1x16x16xf32>
    %623 = vector.shape_cast %622 : vector<1x16x16xf32> to vector<16x16xf32>
    %624 = vector.broadcast %621 : f32 to vector<16x16xf32>
    %625 = arith.mulf %624, %623 : vector<16x16xf32>
    %626 = arith.addf %620, %625 : vector<16x16xf32>
    %c96 = arith.constant 96 : index
    %627 = memref.load %arg2[%c96] : memref<98xf32, #tpu.memory_space<smem>>
    %c12_329 = arith.constant 12 : index
    %c6_330 = arith.constant 6 : index
    %c0_331 = arith.constant 0 : index
    %628 = vector.load %arg4[%c12_329, %c6_330, %c0_331] : memref<14x22x16xf32, #tpu.memory_space<vmem>>, vector<1x16x16xf32>
    %629 = vector.shape_cast %628 : vector<1x16x16xf32> to vector<16x16xf32>
    %630 = vector.broadcast %627 : f32 to vector<16x16xf32>
    %631 = arith.mulf %630, %629 : vector<16x16xf32>
    %632 = arith.addf %626, %631 : vector<16x16xf32>
    %c55 = arith.constant 55 : index
    %633 = memref.load %arg2[%c55] : memref<98xf32, #tpu.memory_space<smem>>
    %c13_332 = arith.constant 13 : index
    %c0_333 = arith.constant 0 : index
    %c0_334 = arith.constant 0 : index
    %634 = vector.load %arg4[%c13_332, %c0_333, %c0_334] : memref<14x22x16xf32, #tpu.memory_space<vmem>>, vector<1x16x16xf32>
    %635 = vector.shape_cast %634 : vector<1x16x16xf32> to vector<16x16xf32>
    %636 = vector.broadcast %633 : f32 to vector<16x16xf32>
    %637 = arith.mulf %636, %635 : vector<16x16xf32>
    %638 = arith.addf %632, %637 : vector<16x16xf32>
    %c62 = arith.constant 62 : index
    %639 = memref.load %arg2[%c62] : memref<98xf32, #tpu.memory_space<smem>>
    %c13_335 = arith.constant 13 : index
    %c1_336 = arith.constant 1 : index
    %c0_337 = arith.constant 0 : index
    %640 = vector.load %arg4[%c13_335, %c1_336, %c0_337] : memref<14x22x16xf32, #tpu.memory_space<vmem>>, vector<1x16x16xf32>
    %641 = vector.shape_cast %640 : vector<1x16x16xf32> to vector<16x16xf32>
    %642 = vector.broadcast %639 : f32 to vector<16x16xf32>
    %643 = arith.mulf %642, %641 : vector<16x16xf32>
    %644 = arith.addf %638, %643 : vector<16x16xf32>
    %c69 = arith.constant 69 : index
    %645 = memref.load %arg2[%c69] : memref<98xf32, #tpu.memory_space<smem>>
    %c13_338 = arith.constant 13 : index
    %c2_339 = arith.constant 2 : index
    %c0_340 = arith.constant 0 : index
    %646 = vector.load %arg4[%c13_338, %c2_339, %c0_340] : memref<14x22x16xf32, #tpu.memory_space<vmem>>, vector<1x16x16xf32>
    %647 = vector.shape_cast %646 : vector<1x16x16xf32> to vector<16x16xf32>
    %648 = vector.broadcast %645 : f32 to vector<16x16xf32>
    %649 = arith.mulf %648, %647 : vector<16x16xf32>
    %650 = arith.addf %644, %649 : vector<16x16xf32>
    %c76 = arith.constant 76 : index
    %651 = memref.load %arg2[%c76] : memref<98xf32, #tpu.memory_space<smem>>
    %c13_341 = arith.constant 13 : index
    %c3_342 = arith.constant 3 : index
    %c0_343 = arith.constant 0 : index
    %652 = vector.load %arg4[%c13_341, %c3_342, %c0_343] : memref<14x22x16xf32, #tpu.memory_space<vmem>>, vector<1x16x16xf32>
    %653 = vector.shape_cast %652 : vector<1x16x16xf32> to vector<16x16xf32>
    %654 = vector.broadcast %651 : f32 to vector<16x16xf32>
    %655 = arith.mulf %654, %653 : vector<16x16xf32>
    %656 = arith.addf %650, %655 : vector<16x16xf32>
    %c83 = arith.constant 83 : index
    %657 = memref.load %arg2[%c83] : memref<98xf32, #tpu.memory_space<smem>>
    %c13_344 = arith.constant 13 : index
    %c4_345 = arith.constant 4 : index
    %c0_346 = arith.constant 0 : index
    %658 = vector.load %arg4[%c13_344, %c4_345, %c0_346] : memref<14x22x16xf32, #tpu.memory_space<vmem>>, vector<1x16x16xf32>
    %659 = vector.shape_cast %658 : vector<1x16x16xf32> to vector<16x16xf32>
    %660 = vector.broadcast %657 : f32 to vector<16x16xf32>
    %661 = arith.mulf %660, %659 : vector<16x16xf32>
    %662 = arith.addf %656, %661 : vector<16x16xf32>
    %c90 = arith.constant 90 : index
    %663 = memref.load %arg2[%c90] : memref<98xf32, #tpu.memory_space<smem>>
    %c13_347 = arith.constant 13 : index
    %c5_348 = arith.constant 5 : index
    %c0_349 = arith.constant 0 : index
    %664 = vector.load %arg4[%c13_347, %c5_348, %c0_349] : memref<14x22x16xf32, #tpu.memory_space<vmem>>, vector<1x16x16xf32>
    %665 = vector.shape_cast %664 : vector<1x16x16xf32> to vector<16x16xf32>
    %666 = vector.broadcast %663 : f32 to vector<16x16xf32>
    %667 = arith.mulf %666, %665 : vector<16x16xf32>
    %668 = arith.addf %662, %667 : vector<16x16xf32>
    %c97 = arith.constant 97 : index
    %669 = memref.load %arg2[%c97] : memref<98xf32, #tpu.memory_space<smem>>
    %c13_350 = arith.constant 13 : index
    %c6_351 = arith.constant 6 : index
    %c0_352 = arith.constant 0 : index
    %670 = vector.load %arg4[%c13_350, %c6_351, %c0_352] : memref<14x22x16xf32, #tpu.memory_space<vmem>>, vector<1x16x16xf32>
    %671 = vector.shape_cast %670 : vector<1x16x16xf32> to vector<16x16xf32>
    %672 = vector.broadcast %669 : f32 to vector<16x16xf32>
    %673 = arith.mulf %672, %671 : vector<16x16xf32>
    %674 = arith.addf %668, %673 : vector<16x16xf32>
    %cst_353 = arith.constant 5.000000e-01 : f32
    %675 = vector.broadcast %cst_353 : f32 to vector<16x16xf32>
    %676 = arith.mulf %675, %674 : vector<16x16xf32>
    %677 = math.tanh %676 : vector<16x16xf32>
    %cst_354 = arith.constant 1.000000e+00 : f32
    %678 = vector.broadcast %cst_354 : f32 to vector<16x16xf32>
    %679 = arith.addf %677, %678 : vector<16x16xf32>
    %cst_355 = arith.constant 5.000000e-01 : f32
    %680 = vector.broadcast %cst_355 : f32 to vector<16x16xf32>
    %681 = arith.mulf %680, %679 : vector<16x16xf32>
    %c0_356 = arith.constant 0 : index
    %c0_357 = arith.constant 0 : index
    %c0_358 = arith.constant 0 : index
    %c0_359 = arith.constant 0 : index
    %682 = vector.load %arg3[%c0_356, %c0_357, %c0_358, %c0_359] : memref<1x1x16x16xf32, #tpu.memory_space<vmem>>, vector<1x1x16x16xf32>
    %683 = vector.shape_cast %682 : vector<1x1x16x16xf32> to vector<16x16xf32>
    %684 = vector.shape_cast %681 : vector<16x16xf32> to vector<1x1x16x16xf32>
    tpu.vector_store %arg3[%c0_356, %c0_357, %c0_358, %c0_359], %684 {strides = array<i32>} : memref<1x1x16x16xf32, #tpu.memory_space<vmem>>, vector<1x1x16x16xf32>,
    return
  }
  func.func @transform_0(%arg0: i32) -> (i32, i32, i32, i32) {
    %c0_i32 = arith.constant 0 : i32
    %c0_i32_0 = arith.constant 0 : i32
    %c0_i32_1 = arith.constant 0 : i32
    %c0_i32_2 = arith.constant 0 : i32
    return %arg0, %c0_i32, %c0_i32_0, %c0_i32_1 : i32, i32, i32, i32
  }
  func.func @transform_1(%arg0: i32) -> i32 {
    %c0_i32 = arith.constant 0 : i32
    %c0_i32_0 = arith.constant 0 : i32
    return %c0_i32 : i32
  }
  func.func @transform_2(%arg0: i32) -> (i32, i32, i32, i32) {
    %c0_i32 = arith.constant 0 : i32
    %c0_i32_0 = arith.constant 0 : i32
    %c0_i32_1 = arith.constant 0 : i32
    %c0_i32_2 = arith.constant 0 : i32
    return %arg0, %c0_i32, %c0_i32_0, %c0_i32_1 : i32, i32, i32, i32
  }
}

</mosaic_0001>

<bundles_post_ra>
// kernel: tpu_custom_call.1
= control target key start
LH: loop header
LB: loop body
LE: loop exit
PB: predicated region body
PF: predicated region fallthrough
CT: control target
= control target key end

     0   :  { %7 = vsyncpa [#allocation4], 0  ;;  %s2176_s0 = inlined_call_operand.hbm [shape: f32[2,4,16,16], index: 0, kind: input, shape index: {}]   ;;  %s2177_s1 = inlined_call_operand.vmem [shape: f32[98], index: 1, kind: input, shape index: {}]   ;;  %s2178_s2 = inlined_call_operand.hbm [shape: f32[2,1,16,16], index: 2, kind: output, shape index: {}]  }
   0x1   :  { %9 = vsyncpa [#allocation4 + $0x1], 0 }
   0x2   :  { %10 = vsyncpa [#allocation6], 0 }
   0x3   :  { %11 = vsyncpa [#allocation5], 0 }
   0x4   :  { %13 = vsyncpa [#allocation5 + $0x1], 0  ;;  %s1647_s9 = smov 0   ;;  %s1649_s10 = smov 0  }
   0x5   :  { %s1651_s11 = smov 0   ;;  %s1653_s12 = smov 0  }
   0x6 LB: > { %s1668_s13 = sadd.s32 4294967295, %s1616_s12   ;;  %s1312_s14 = sadd.s32 4294967294, %s1616_s12   ;;  %s1616_s12 = sphi %s1653_s12, %s2200_s12   ;;  %s1612_s11 = sphi %s1651_s11, %s2199_s11   ;;  %s1608_s10 = sphi %s1649_s10, %s2198_s10   ;;  %s1604_s9 = sphi %s1647_s9, %s2197_s9  }
   0x7   : > { %s1672_s15 = sadd.s32 1, %s1616_s12   ;;  %s26_s16 = sadd.s32 1, %s1612_s11 }
   0x8   : > { %s23_s17 = ssub.s32 %s1616_s12, %s1672_s15  ;;  %p33_p0 = scmp.ne.s32.totalorder %s1612_s11, %s1608_s10 }
   0x9   : > { %p24_p1 = scmp.eq.s32.totalorder %s23_s17, 0  ;;  %p34_p2 = scmp.eq.s32.totalorder %s1616_s12, 0 }
   0xa   : > { %p39_p3 = scmp.ne.s32.totalorder %s1608_s10, %s1604_s9  ;;  %p2180_p4 = scmp.eq.s32.totalorder %s1668_s13, 0 }
   0xb   : > { %s1684_s18 = scalar_select %p24_p1, %s1612_s11, %s26_s16  }
   0xc   : > { %p1686_p5 = por %p34_p2, %p33_p0  ;;  %p1692_p6 = por %p2180_p4, %p39_p3 }
   0xd   : > { %p84_p7 = scmp.eq.s32.totalorder %s1668_s13, 1  ;;  %p90_p8 = scmp.eq.s32.totalorder %s1312_s14, 1 }
   0xe   : > { %s2184_s20 = scalar_select %p1692_p6, 1, 0 }
   0xf   : > { %p1313_p9 = scmp.ge.s32.totalorder %s1616_s12, 1  ;;  %p97_p10 = scmp.lt.s32.totalorder %s1616_s12, 3 }
  0x10   : > { %p1699_p11 = por %p84_p7, %p33_p0  ;;  %p1703_p12 = por %p90_p8, %p39_p3 }
  0x11   : > { %p1707_p13 = pnand %p1313_p9, %p97_p10  ;;  %s110_s26 = sshll.u32 %s2177_s1, 4  ;;  %s111_s26 = int_to_ptr.vmem [resolvable:$true] %s110_s26 }
  0x12   : > { %s2185_s21 = scalar_select %p1699_p11, 1, 0 }
  0x13   : > { %s2186_s22 = scalar_select %p1703_p12, 1, 0 }
  0x14   : > { %s2187_s23 = scalar_select %p1707_p13, 1, 0 }
  0x15   : > { %p1441_p1 = pneg %p1707_p13  ;;  %p1454_p2 = scmp.lt.s32.totalorder %s1616_s12, 2 }
  0x16   : > { %s121_s28 = sand.u32 1, %s1612_s11   ;;  %s1505_s3 = scalar_lea.vmem %s111_s26, 16 }
  0x17   : > { %p1720_p7 = pnand %p1441_p1, %p2180_p4  ;;  %p1727_p3 = pnand %p1454_p2, %p1686_p5 }
  0x18   : > { %s1316_s30 = sshll.u32 %s121_s28, 6  ;;  %p1506_p8 = scmp.ne.s32.totalorder %s111_s26, %s1505_s3 }
  0x19   : > { %p1507_p9 = pneg %p1720_p7  ;;  %p1513_p12 = scmp.lt.s32.totalorder %s111_s26, %s111_s26 }
  0x1a   : > { %p1514_p11 = scmp.lt.s32.totalorder %s1505_s3, %s1505_s3 }
  0x1b   : > { %p1508_p10 = pnand %p1507_p9, %p1506_p8 }
  0x1c   : > { %p1515_p1 = por %p1514_p11, %p1513_p12 }
  0x1d   : > { %p1509_p0 = pneg %p1508_p10 }
  0x1f   : > { %p1516_p4 = pnand %p1515_p1, %p1509_p0 }
  0x21   : > { %1519 = shalt.err (!%p1516_p4)
}
  0x22   : > { %s1618_s4 = smov [#allocation7]   ;;  %s1431_s5 = sshll.u32 %s1616_s12, 10 }
  0x23   : > { %1444 = dma.vmem_to_smem (!%p1720_p7), %s111_s26, 16, %s1618_s4, [#allocation6]  }
  0x24   : > { %s125_s6 = scalar_lea.vmem [#allocation3], %s1316_s30  ;;  %s1739_s16 = scalar_lea.hbm %s2176_s0, %s1431_s5 }
  0x25   : > { %s132_s7 = sshll.u32 %s125_s6, 4  ;;  %s1743_s17 = scalar_lea.sflag [#allocation4], %s121_s28  ;;  %s1741_s7 = int_to_ptr.vmem [resolvable:$true] %s132_s7 }
  0x26   : > { %s1520_s19 = scalar_lea.hbm %s1739_s16, 1024  ;;  %p1522_p5 = pneg %p1727_p3 }
  0x27   : > { %p1521_p4 = scmp.ne.s32.totalorder %s1739_s16, %s1520_s19  ;;  %s1525_s26 = scalar_lea.hbm %s2176_s0, 2048 }
  0x28   : > { %p1526_p0 = scmp.lt.s32.totalorder %s1739_s16, %s2176_s0  ;;  %p1527_p2 = scmp.lt.s32.totalorder %s1525_s26, %s1520_s19 }
  0x29   : > { %p1523_p11 = pnand %p1522_p5, %p1521_p4 }
  0x2a   : > { %p1528_p7 = por %p1527_p2, %p1526_p0 }
  0x2b   : > { %p1524_p12 = pneg %p1523_p11 }
  0x2d   : > { %p1529_p8 = pnand %p1528_p7, %p1524_p12 }
  0x2f   : > { %1532 = shalt.err (!%p1529_p8)
}
  0x30   : > { %s1533_s28 = scalar_lea.vmem %s1741_s7, 1024  ;;  %s1619_s3 = smov [#allocation3]  }
  0x31   : > { %p1534_p9 = scmp.ne.s32.totalorder %s1741_s7, %s1533_s28  ;;  %s1538_s4 = sshll.u32 %s1619_s3, 4  ;;  %s1539_s4 = int_to_ptr.vmem [resolvable:$false] %s1538_s4 }
  0x32   : > { %s1540_s5 = scalar_lea.vmem %s1539_s4, 2048  ;;  %p1541_p4 = scmp.lt.s32.totalorder %s1741_s7, %s1539_s4 }
  0x33   : > { %p1536_p10 = pnand %p1534_p9, %p1522_p5  ;;  %p1542_p11 = scmp.lt.s32.totalorder %s1540_s5, %s1533_s28 }
  0x35   : > { %p1537_p1 = pneg %p1536_p10  ;;  %p1543_p6 = por %p1542_p11, %p1541_p4 }
  0x37   : > { %p1544_p13 = pnand %p1543_p6, %p1537_p1 }
  0x39   : > { %1547 = shalt.err (!%p1544_p13)
}
  0x3a   : > { %s1620_s6 = smov 128   ;;  %s1621_s8 = smov 8  }
  0x3b   : > { %1448 = dma.hbm_to_vmem [thread:$0]  (!%p1727_p3), %s1739_s16, 1024, %s1741_s7, %s1743_s17, %s1620_s6, %s1620_s6, %s1621_s8  }
  0x3c   : > { %p2190_p5 = scmp.ne.s32.totalorder %s2187_s23, 0 }
  0x3d   : > { %s1767_s14 = sand.u32 (!%p2190_p5), 1, %s1608_s10   ;;  %p2191_p6 = scmp.ne.s32.totalorder (!%p2190_p5), %s2184_s20, 0 }
  0x3e   : > { %144 = sbr.rel (%p2190_p5) target bundleno = 589 (0x24d), region = 28  ;;  %s1320_s19 = sshll.u32 (!%p2190_p5), %s1767_s14, 6 }
  0x3f   : > { %s147_s24 = scalar_lea.sflag (!%p2190_p5), [#allocation4], %s1767_s14  ;;  %s150_s25 = scalar_lea.vmem (!%p2190_p5), [#allocation3], %s1320_s19 }
  0x43   : > { %1591 = dma.done.wait (%p2191_p6), %s147_s24, 1024  }
  0x44   : > { %1593 = vsyncadd (%p2191_p6), %s147_s24, 4294966272  ;;  %p2192_p13 = scmp.eq.s32.totalorder %s1668_s13, 0 }
  0x46   : > { %1595 = dma.done.wait (%p2192_p13), [#allocation6], 16   ;;  %p2193_p3 = pmov %p2192_p13 }
  0x48   : > { %1597 = vsyncadd (%p2193_p3), [#allocation6], 4294967280 }
  0x49   : > { %159 = sfence }
  0x4a   : > { %v176_v0 = vld [vmem:[%s150_s25] sm:$0xff]  ;;  %v1323_v1 = vld [vmem:[%s150_s25 + $0x10] sm:$0xff]  ;;  %v177_v4 = vld [vmem:[%s150_s25 + $0x8] sm:$0xff]  ;;  %s1622_s20 = smov 3   ;;  %vm211_vm0 = vcmask 23552   ;;  %vm214_vm1 = vcmask 154624  }
  0x4b   : > { %v1325_v2 = vld [vmem:[%s150_s25 + $0x20] sm:$0xff]  ;;  %v183_v3 = vadd.f32 %v1323_v1, %v176_v0  ;;  %v1324_v5 = vld [vmem:[%s150_s25 + $0x18] sm:$0xff]  ;;  %v1327_v6 = vld [vmem:[%s150_s25 + $0x30] sm:$0xff]  ;;  %v185_v17 = vmax.f32 %v176_v0, %v1323_v1  ;;  %vm219_vm2 = vcmask 1042432   ;;  %vm228_vm3 = vcmask 130048   ;;  %s1623_s23 = smov 127  }
  0x4c   : > { %v184_v7 = vadd.f32 %v1324_v5, %v177_v4  ;;  %v1326_v8 = vld [vmem:[%s150_s25 + $0x28] sm:$0xff]  ;;  %v1328_v10 = vld [vmem:[%s150_s25 + $0x38] sm:$0xff]  ;;  %v186_v16 = vmax.f32 %v177_v4, %v1324_v5  ;;  %vm231_vm4 = vcmask 128000   ;;  %s1624_s29 = smov 126   ;;  %s1625_s7 = smov 125  }
  0x4d   : > { %v190_v9 = vadd.f32 %v1325_v2, %v183_v3  ;;  %v192_v19 = vmax.f32 %v185_v17, %v1325_v2  ;;  %s1626_s16 = smov 124   ;;  %s1627_s17 = smov 123  }
  0x4e   : > { %v191_v11 = vadd.f32 %v1326_v8, %v184_v7  ;;  %v193_v18 = vmax.f32 %v186_v16, %v1326_v8  ;;  %s1628_s26 = smov 122   ;;  %s1329_s27 = sld [smem:[#allocation7 + $0x7]] }
  0x4f   : > { %v197_v12 = vadd.f32 %v1327_v6, %v190_v9  ;;  %v199_v21 = vmax.f32 %v192_v19, %v1327_v6  ;;  %s419_s30 = sld [smem:[#allocation7]]  ;;  %p2194_p0 = scmp.ne.s32.totalorder %s2185_s21, 0 }
  0x50   : > { %v198_v13 = vadd.f32 %v1328_v10, %v191_v11  ;;  %v200_v20 = vmax.f32 %v193_v18, %v1328_v10  ;;  %s1330_s28 = sld [smem:[#allocation7 + $0xe]] }
  0x51   : > { %v201_v14 = vmul.f32 0.25, %v197_v12  ;;  %s1331_s3 = sld [smem:[#allocation7 + $0x15]] }
  0x52   : > { %v202_v15 = vmul.f32 0.25, %v198_v13  ;;  %s1332_s4 = sld [smem:[#allocation7 + $0x1c]] }
  0x53   : > { %205 = vrot.lane.b32.xlu0 %v201_v14, %s1622_s20  ;;  %s1811_s5 = sld [smem:[#allocation7 + $0x23]] }
  0x54   : > { %v430_v33 = vstv %s1329_s27  ;;  %s1813_s6 = sld [smem:[#allocation7 + $0x2a]] }
  0x55   : > { %v422_v35 = vstv %s419_s30  ;;  %s1815_s8 = sld [smem:[#allocation7 + $0x1]] }
  0x56   : > { %v438_v43 = vstv %s1330_s28  ;;  %s1819_s19 = sld [smem:[#allocation7 + $0x8]] }
  0x57   : > { %207 = vrot.lane.b32.xlu0 %v202_v15, %s1622_s20  ;;  %v446_v49 = vstv %s1331_s3  ;;  %s1821_s24 = sld [smem:[#allocation7 + $0xf]] }
  0x58   : > { %v454_v56 = vstv %s1332_s4  ;;  %s1827_s25 = sld [smem:[#allocation7 + $0x16]] }
  0x59   : > { %v462_v0 = vstv %s1811_s5  ;;  %s1834_s27 = sld [smem:[#allocation7 + $0x24]] }
  0x5a   : > { %v470_v9 = vstv %s1813_s6  ;;  %s1837_s30 = sld [smem:[#allocation7 + $0x2b]] }
  0x5b   : > { %v478_v11 = vstv %s1815_s8  ;;  %s1842_s28 = sld [smem:[#allocation7 + $0x2]] }
  0x5c   : > { %s1844_s3 = sld [smem:[#allocation7 + $0x9]] }
  0x5d   : > { %s1847_s4 = sld [smem:[#allocation7 + $0x10]] }
  0x5e   : > { %s1852_s5 = sld [smem:[#allocation7 + $0x17]] }
  0x5f   : > { %s1855_s6 = sld [smem:[#allocation7 + $0x1e]] }
  0x60   : > { %s1861_s8 = sld [smem:[#allocation7 + $0x25]] }
  0xc5   : > { %v206_v22 = vpop.permute.xlu0 %205 }
  0xc6   : > { %v212_v23 = vsel %vm211_vm0, 0.0, %v206_v22 }
  0xc7   : > { %v215_v24 = vsel %vm214_vm1, %v212_v23, 0.0 }
  0xc8   : > { %v220_v25 = vrot.slane %v215_v24, 5  ;;  %v494_v24 = vstv %s1821_s24  ;;  %s1871_s24 = sld [smem:[#allocation7 + $0x3]] }
  0xc9   : > { %v208_v26 = vpop.permute.xlu0 %207 }
  0xca   : > { %v226_v27 = vsel %vm219_vm2, 0.0, %v220_v25  ;;  %v213_v28 = vsel %vm211_vm0, 0.0, %v208_v26 }
  0xcb   : > { %229 = vst.msk [vmem:[#allocation2] sm:$0xff] %vm228_vm3, %v226_v27  ;;  %v216_v29 = vsel %vm214_vm1, %v213_v28, 0.0  ;;  %235 = vrot.lane.b32.xlu1 %v226_v27, %s1623_s23 }
  0xcc   : > { %v221_v30 = vrot.slane %v216_v29, 5 }
  0xce   : > { %v222_v31 = vsel %vm219_vm2, %v220_v25, %v221_v30  ;;  %v227_v32 = vsel %vm219_vm2, %v221_v30, 0.0 }
  0xcf   : > { %230 = vst.msk [vmem:[#allocation2 + $0x8] sm:$0xff] %vm228_vm3, %v222_v31  ;;  %239 = vrot.lane.b32.xlu0 %v227_v32, %s1623_s23  ;;  %237 = vrot.lane.b32.xlu1 %v222_v31, %s1623_s23 }
  0xd0   : > { %232 = vst.msk [vmem:[#allocation2 + $0x10] sm:$0x3f] %vm231_vm4, %v227_v32 }
  0xd2   : > { %v420_v36 = vld [vmem:[#allocation2] sm:$0xff] }
  0xd3   : > { %250 = vrot.lane.b32.xlu0 %v222_v31, %s1624_s29  ;;  %248 = vrot.lane.b32.xlu1 %v226_v27, %s1624_s29  ;;  %v423_v40 = vmul.f32 %v422_v35, %v420_v36 }
  0xd6   : > { %v428_v34 = vld [vmem:[#allocation2 + $0x1] sm:$0xff] }
  0xd7   : > { %261 = vrot.lane.b32.xlu0 %v226_v27, %s1625_s7  ;;  %252 = vrot.lane.b32.xlu1 %v227_v32, %s1624_s29  ;;  %v421_v37 = vld [vmem:[#allocation2 + $0x8] sm:$0xff]  ;;  %v431_v39 = vmul.f32 %v430_v33, %v428_v34 }
  0xd8   : > { %v429_v38 = vld [vmem:[#allocation2 + $0x9] sm:$0xff]  ;;  %v424_v41 = vmul.f32 %v422_v35, %v421_v37  ;;  %v502_v35 = vstv %s1827_s25  ;;  %s1875_s25 = sld [smem:[#allocation7 + $0xa]] }
  0xd9   : > { %v432_v42 = vmul.f32 %v430_v33, %v429_v38  ;;  %v436_v44 = vld [vmem:[#allocation2 + $0x2] sm:$0xff]  ;;  %v433_v45 = vadd.f32 %v431_v39, %v423_v40  ;;  %v437_v46 = vld [vmem:[#allocation2 + $0xa] sm:$0xff] }
  0xda   : > { %v439_v48 = vmul.f32 %v438_v43, %v436_v44  ;;  %v444_v50 = vld [vmem:[#allocation2 + $0x3] sm:$0xff]  ;;  %v440_v51 = vmul.f32 %v438_v43, %v437_v46  ;;  %v445_v53 = vld [vmem:[#allocation2 + $0xb] sm:$0xff] }
  0xdb   : > { %265 = vrot.lane.b32.xlu0 %v227_v32, %s1625_s7  ;;  %263 = vrot.lane.b32.xlu1 %v222_v31, %s1625_s7  ;;  %v434_v47 = vadd.f32 %v432_v42, %v424_v41  ;;  %v447_v55 = vmul.f32 %v446_v49, %v444_v50  ;;  %v452_v57 = vld [vmem:[#allocation2 + $0x4] sm:$0xff]  ;;  %v448_v58 = vmul.f32 %v446_v49, %v445_v53  ;;  %v453_v60 = vld [vmem:[#allocation2 + $0xc] sm:$0xff] }
  0xdc   : > { %v441_v52 = vadd.f32 %v439_v48, %v433_v45  ;;  %v455_v63 = vmul.f32 %v454_v56, %v452_v57  ;;  %v460_v1 = vld [vmem:[#allocation2 + $0x5] sm:$0xff]  ;;  %v456_v2 = vmul.f32 %v454_v56, %v453_v60  ;;  %v461_v4 = vld [vmem:[#allocation2 + $0xd] sm:$0xff] }
  0xdd   : > { %v442_v54 = vadd.f32 %v440_v51, %v434_v47  ;;  %v463_v8 = vmul.f32 %v462_v0, %v460_v1  ;;  %v468_v10 = vld [vmem:[#allocation2 + $0x6] sm:$0xff]  ;;  %v464_v12 = vmul.f32 %v462_v0, %v461_v4  ;;  %v469_v14 = vld [vmem:[#allocation2 + $0xe] sm:$0xff]  ;;  %v518_v51 = vstv %s1834_s27  ;;  %s1895_s27 = sld [smem:[#allocation7 + $0x18]] }
  0xde   : > { %v449_v59 = vadd.f32 %v447_v55, %v441_v52  ;;  %v471_v19 = vmul.f32 %v470_v9, %v468_v10  ;;  %v472_v22 = vmul.f32 %v470_v9, %v469_v14 }
  0xdf   : > { %317 = vrot.lane.b32.xlu0 %v200_v20, %s1622_s20  ;;  %315 = vrot.lane.b32.xlu1 %v199_v21, %s1622_s20  ;;  %v450_v62 = vadd.f32 %v448_v58, %v442_v54  ;;  %s1829_s20 = sld [smem:[#allocation7 + $0x1d]]  ;;  %v486_v21 = vstv %s1819_s19 }
  0xe0   : > { %v457_v3 = vadd.f32 %v455_v63, %v449_v59  ;;  %v526_v59 = vstv %s1837_s30  ;;  %s1866_s19 = sld [smem:[#allocation7 + $0x2c]] }
  0xe1   : > { %v458_v7 = vadd.f32 %v456_v2, %v450_v62  ;;  %s1906_s30 = sld [smem:[#allocation7 + $0x1f]] }
  0xe2   : > { %v465_v13 = vadd.f32 %v463_v8, %v457_v3 }
  0xe3   : > { %276 = vrot.lane.b32.xlu0 %v222_v31, %s1626_s16  ;;  %274 = vrot.lane.b32.xlu1 %v226_v27, %s1626_s16  ;;  %v466_v18 = vadd.f32 %v464_v12, %v458_v7  ;;  %v542_v12 = vstv %s1844_s3  ;;  %s1918_s3 = sld [smem:[#allocation7 + $0x2d]] }
  0xe4   : > { %v473_v23 = vadd.f32 %v471_v19, %v465_v13  ;;  %v550_v13 = vstv %s1847_s4  ;;  %s1929_s4 = sld [smem:[#allocation7 + $0xb]] }
  0xe5   : > { %v474_v30 = vadd.f32 %v472_v22, %v466_v18  ;;  %v510_v42 = vstv %s1829_s20  ;;  %s1882_s20 = sld [smem:[#allocation7 + $0x11]] }
  0xe7   : > { %287 = vrot.lane.b32.xlu0 %v226_v27, %s1627_s17  ;;  %278 = vrot.lane.b32.xlu1 %v227_v32, %s1626_s16 }
  0xeb   : > { %291 = vrot.lane.b32.xlu0 %v227_v32, %s1627_s17  ;;  %289 = vrot.lane.b32.xlu1 %v222_v31, %s1627_s17 }
  0xef   : > { %302 = vrot.lane.b32.xlu0 %v222_v31, %s1628_s26  ;;  %300 = vrot.lane.b32.xlu1 %v226_v27, %s1628_s26 }
  0xf3   : > { %304 = vrot.lane.b32.xlu1 %v227_v32, %s1628_s26 }
 0x13d   : > { %v236_v61 = vpop.permute.xlu1 %235 }
 0x13e   : > { %245 = vst.msk [vmem:[#allocation2 + $0x18] sm:$0xff] %vm228_vm3, %v236_v61 }
 0x141   : > { %v240_v5 = vpop.permute.xlu0 %239  ;;  %v238_v6 = vpop.permute.xlu1 %237 }
 0x142   : > { %247 = vst.msk [vmem:[#allocation2 + $0x28] sm:$0x3f] %vm231_vm4, %v240_v5  ;;  %v534_v5 = vstv %s1842_s28  ;;  %s1911_s28 = sld [smem:[#allocation7 + $0x26]] }
 0x143   : > { %246 = vst.msk [vmem:[#allocation2 + $0x20] sm:$0xff] %vm228_vm3, %v238_v6 }
 0x145   : > { %v476_v15 = vld [vmem:[#allocation2 + $0x18] sm:$0xff]  ;;  %v251_v16 = vpop.permute.xlu0 %250  ;;  %v249_v17 = vpop.permute.xlu1 %248 }
 0x146   : > { %v479_v20 = vmul.f32 %v478_v11, %v476_v15  ;;  %259 = vst.msk [vmem:[#allocation2 + $0x38] sm:$0xff] %vm228_vm3, %v251_v16  ;;  %258 = vst.msk [vmem:[#allocation2 + $0x30] sm:$0xff] %vm228_vm3, %v249_v17 }
 0x148   : > { %v481_v31 = vadd.f32 %v479_v20, %v473_v23  ;;  %v558_v23 = vstv %s1852_s5  ;;  %s1932_s5 = sld [smem:[#allocation7 + $0x12]] }
 0x149   : > { %v262_v28 = vpop.permute.xlu0 %261  ;;  %v253_v29 = vpop.permute.xlu1 %252 }
 0x14a   : > { %v477_v25 = vld [vmem:[#allocation2 + $0x20] sm:$0xff]  ;;  %271 = vst.msk [vmem:[#allocation2 + $0x48] sm:$0xff] %vm228_vm3, %v262_v28 }
 0x14b   : > { %v484_v26 = vld [vmem:[#allocation2 + $0x19] sm:$0xff]  ;;  %v485_v27 = vld [vmem:[#allocation2 + $0x21] sm:$0xff]  ;;  %v480_v32 = vmul.f32 %v478_v11, %v477_v25  ;;  %260 = vst.msk [vmem:[#allocation2 + $0x40] sm:$0x3f] %vm231_vm4, %v253_v29 }
 0x14c   : > { %v487_v33 = vmul.f32 %v486_v21, %v484_v26  ;;  %v492_v34 = vld [vmem:[#allocation2 + $0x1a] sm:$0xff]  ;;  %v493_v36 = vld [vmem:[#allocation2 + $0x22] sm:$0xff]  ;;  %v488_v39 = vmul.f32 %v486_v21, %v485_v27 }
 0x14d   : > { %v500_v37 = vld [vmem:[#allocation2 + $0x1b] sm:$0xff]  ;;  %v482_v38 = vadd.f32 %v480_v32, %v474_v30  ;;  %v495_v41 = vmul.f32 %v494_v24, %v492_v34  ;;  %v501_v43 = vld [vmem:[#allocation2 + $0x23] sm:$0xff]  ;;  %v266_v45 = vpop.permute.xlu0 %265  ;;  %v264_v46 = vpop.permute.xlu1 %263  ;;  %v496_v48 = vmul.f32 %v494_v24, %v493_v36  ;;  %v532_v6 = vld [vmem:[#allocation2 + $0x30] sm:$0xff]  ;;  %v566_v32 = vstv %s1855_s6  ;;  %s1947_s6 = sld [smem:[#allocation7 + $0x20]] }
 0x14e   : > { %v489_v40 = vadd.f32 %v487_v33, %v481_v31  ;;  %v508_v44 = vld [vmem:[#allocation2 + $0x1c] sm:$0xff]  ;;  %v503_v50 = vmul.f32 %v502_v35, %v500_v37  ;;  %273 = vst.msk [vmem:[#allocation2 + $0x58] sm:$0x3f] %vm231_vm4, %v266_v45  ;;  %v509_v52 = vld [vmem:[#allocation2 + $0x24] sm:$0xff]  ;;  %v504_v55 = vmul.f32 %v502_v35, %v501_v43  ;;  %v540_v14 = vld [vmem:[#allocation2 + $0x31] sm:$0xff]  ;;  %v535_v20 = vmul.f32 %v534_v5, %v532_v6 }
 0x14f   : > { %v490_v47 = vadd.f32 %v488_v39, %v482_v38  ;;  %272 = vst.msk [vmem:[#allocation2 + $0x50] sm:$0xff] %vm228_vm3, %v264_v46  ;;  %v516_v53 = vld [vmem:[#allocation2 + $0x1d] sm:$0xff]  ;;  %v511_v57 = vmul.f32 %v510_v42, %v508_v44  ;;  %v517_v58 = vld [vmem:[#allocation2 + $0x25] sm:$0xff]  ;;  %v512_v0 = vmul.f32 %v510_v42, %v509_v52  ;;  %v548_v21 = vld [vmem:[#allocation2 + $0x32] sm:$0xff]  ;;  %v543_v28 = vmul.f32 %v542_v12, %v540_v14 }
 0x150   : > { %v497_v49 = vadd.f32 %v495_v41, %v489_v40  ;;  %v524_v60 = vld [vmem:[#allocation2 + $0x1e] sm:$0xff]  ;;  %v519_v2 = vmul.f32 %v518_v51, %v516_v53  ;;  %v520_v3 = vmul.f32 %v518_v51, %v517_v58  ;;  %v525_v4 = vld [vmem:[#allocation2 + $0x26] sm:$0xff]  ;;  %v556_v29 = vld [vmem:[#allocation2 + $0x33] sm:$0xff]  ;;  %v551_v33 = vmul.f32 %v550_v13, %v548_v21 }
 0x151   : > { %v498_v54 = vadd.f32 %v496_v48, %v490_v47  ;;  %v318_v61 = vpop.permute.xlu0 %317  ;;  %v316_v62 = vpop.permute.xlu1 %315  ;;  %v527_v9 = vmul.f32 %v526_v59, %v524_v60  ;;  %v533_v10 = vld [vmem:[#allocation2 + $0x38] sm:$0xff]  ;;  %v528_v18 = vmul.f32 %v526_v59, %v525_v4  ;;  %v559_v42 = vmul.f32 %v558_v23, %v556_v29  ;;  %v588_v4 = vld [vmem:[#allocation2 + $0x48] sm:$0xff] }
 0x152   : > { %v505_v56 = vadd.f32 %v503_v50, %v497_v49  ;;  %v322_v11 = vsel %vm211_vm0, 0.0, %v318_v61  ;;  %v536_v22 = vmul.f32 %v534_v5, %v533_v10  ;;  %v541_v24 = vld [vmem:[#allocation2 + $0x39] sm:$0xff]  ;;  %v321_v31 = vsel %vm211_vm0, 0.0, %v316_v62 }
 0x153   : > { %v506_v63 = vadd.f32 %v504_v55, %v498_v54  ;;  %v324_v25 = vsel %vm214_vm1, %v322_v11, 0.0  ;;  %v549_v30 = vld [vmem:[#allocation2 + $0x3a] sm:$0xff]  ;;  %v544_v39 = vmul.f32 %v542_v12, %v541_v24  ;;  %v323_v44 = vsel %vm214_vm1, %v321_v31, 0.0 }
 0x154   : > { %v513_v1 = vadd.f32 %v511_v57, %v505_v56  ;;  %v564_v38 = vld [vmem:[#allocation2 + $0x34] sm:$0xff]  ;;  %v328_v41 = vrot.slane %v324_v25, 5  ;;  %v552_v43 = vmul.f32 %v550_v13, %v549_v30  ;;  %v327_v48 = vrot.slane %v323_v44, 5  ;;  %v565_v53 = vld [vmem:[#allocation2 + $0x3c] sm:$0xff] }
 0x155   : > { %v514_v7 = vadd.f32 %v512_v0, %v506_v63  ;;  %v277_v15 = vpop.permute.xlu0 %276  ;;  %v275_v16 = vpop.permute.xlu1 %274  ;;  %v557_v40 = vld [vmem:[#allocation2 + $0x3b] sm:$0xff]  ;;  %v574_v49 = vstv %s1861_s8  ;;  %v567_v50 = vmul.f32 %v566_v32, %v564_v38  ;;  %v582_v60 = vstv %s1866_s19  ;;  %s1363_s8 = sld [smem:[#allocation7 + $0x5]] }
 0x156   : > { %v521_v8 = vadd.f32 %v519_v2, %v513_v1  ;;  %285 = vst.msk [vmem:[#allocation2 + $0x68] sm:$0xff] %vm228_vm3, %v277_v15  ;;  %284 = vst.msk [vmem:[#allocation2 + $0x60] sm:$0xff] %vm228_vm3, %v275_v16  ;;  %v1879_v47 = vsel %vm219_vm2, %v328_v41, 0.0  ;;  %v572_v51 = vld [vmem:[#allocation2 + $0x35] sm:$0xff]  ;;  %v560_v52 = vmul.f32 %v558_v23, %v557_v40  ;;  %v1887_v58 = vsel %vm219_vm2, %v327_v48, %v328_v41  ;;  %v573_v62 = vld [vmem:[#allocation2 + $0x3d] sm:$0xff]  ;;  %s1365_s19 = sld [smem:[#allocation7 + $0x13]] }
 0x157   : > { %v522_v17 = vadd.f32 %v520_v3, %v514_v7  ;;  %338 = vst.msk [vmem:[#allocation2 + $0xb8] sm:$0x3f] %vm231_vm4, %v1879_v47  ;;  %v1890_v59 = vsel %vm219_vm2, 0.0, %v327_v48  ;;  %v580_v61 = vld [vmem:[#allocation2 + $0x36] sm:$0xff]  ;;  %v575_v0 = vmul.f32 %v574_v49, %v572_v51  ;;  %v568_v2 = vmul.f32 %v566_v32, %v565_v53  ;;  %343 = vrot.lane.b32.xlu1 %v1887_v58, %s1623_s23  ;;  %v581_v5 = vld [vmem:[#allocation2 + $0x3e] sm:$0xff]  ;;  %v596_v14 = vld [vmem:[#allocation2 + $0x49] sm:$0xff] }
 0x158   : > { %v529_v19 = vadd.f32 %v527_v9, %v521_v8  ;;  %336 = vst.msk [vmem:[#allocation2 + $0xa8] sm:$0xff] %vm228_vm3, %v1890_v59  ;;  %337 = vst.msk [vmem:[#allocation2 + $0xb0] sm:$0xff] %vm228_vm3, %v1887_v58  ;;  %341 = vrot.lane.b32.xlu0 %v1890_v59, %s1623_s23  ;;  %v590_v3 = vstv %s1871_s24  ;;  %v583_v9 = vmul.f32 %v582_v60, %v580_v61  ;;  %v598_v12 = vstv %s1875_s25  ;;  %v589_v13 = vld [vmem:[#allocation2 + $0x50] sm:$0xff]  ;;  %s1366_s24 = sld [smem:[#allocation7 + $0x1a]] }
 0x159   : > { %v530_v26 = vadd.f32 %v528_v18, %v522_v17  ;;  %v288_v34 = vpop.permute.xlu0 %287  ;;  %v279_v35 = vpop.permute.xlu1 %278  ;;  %v576_v11 = vmul.f32 %v574_v49, %v573_v62  ;;  %v591_v16 = vmul.f32 %v590_v3, %v588_v4  ;;  %v584_v18 = vmul.f32 %v582_v60, %v581_v5  ;;  %v604_v21 = vld [vmem:[#allocation2 + $0x4a] sm:$0xff]  ;;  %s1368_s25 = sld [smem:[#allocation7 + $0x28]] }
 0x15a   : > { %v537_v27 = vadd.f32 %v535_v20, %v529_v19  ;;  %297 = vst.msk [vmem:[#allocation2 + $0x78] sm:$0xff] %vm228_vm3, %v288_v34  ;;  %v606_v19 = vstv %s1882_s20  ;;  %v597_v20 = vld [vmem:[#allocation2 + $0x51] sm:$0xff]  ;;  %v592_v25 = vmul.f32 %v590_v3, %v589_v13  ;;  %v622_v34 = vstv %s1906_s30  ;;  %s1369_s20 = sld [smem:[#allocation7 + $0x2f]] }
 0x15b   : > { %v538_v36 = vadd.f32 %v536_v22, %v530_v26  ;;  %286 = vst.msk [vmem:[#allocation2 + $0x70] sm:$0x3f] %vm231_vm4, %v279_v35  ;;  %354 = vrot.lane.b32.xlu1 %v1890_v59, %s1624_s29  ;;  %v599_v26 = vmul.f32 %v598_v12, %v596_v14  ;;  %v612_v29 = vld [vmem:[#allocation2 + $0x4b] sm:$0xff]  ;;  %v600_v31 = vmul.f32 %v598_v12, %v597_v20  ;;  %v613_v35 = vld [vmem:[#allocation2 + $0x53] sm:$0xff]  ;;  %v630_v41 = vstv %s1911_s28  ;;  %s1371_s30 = sld [smem:[#allocation7 + $0xd]] }
 0x15c   : > { %v545_v37 = vadd.f32 %v543_v28, %v537_v27  ;;  %345 = vrot.lane.b32.xlu0 %v1879_v47, %s1623_s23  ;;  %v614_v27 = vstv %s1895_s27  ;;  %v605_v28 = vld [vmem:[#allocation2 + $0x52] sm:$0xff]  ;;  %s1922_s23 = sld [smem:[#allocation7 + $0x4]]  ;;  %v638_v49 = vstv %s1918_s3 }
 0x15d   : > { %v546_v46 = vadd.f32 %v544_v39, %v538_v36  ;;  %v292_v54 = vpop.permute.xlu0 %291  ;;  %v290_v55 = vpop.permute.xlu1 %289  ;;  %v620_v36 = vld [vmem:[#allocation2 + $0x4c] sm:$0xff]  ;;  %v608_v38 = vmul.f32 %v606_v19, %v605_v28  ;;  %v615_v40 = vmul.f32 %v614_v27, %v612_v29  ;;  %v644_v60 = vld [vmem:[#allocation2 + $0x60] sm:$0xff]  ;;  %s1370_s27 = sld [smem:[#allocation7 + $0x6]] }
 0x15e   : > { %v553_v45 = vadd.f32 %v551_v33, %v545_v37  ;;  %299 = vst.msk [vmem:[#allocation2 + $0x88] sm:$0x3f] %vm231_vm4, %v292_v54  ;;  %v607_v33 = vmul.f32 %v606_v19, %v604_v21  ;;  %v623_v48 = vmul.f32 %v622_v34, %v620_v36  ;;  %v636_v51 = vld [vmem:[#allocation2 + $0x4e] sm:$0xff]  ;;  %v652_v3 = vld [vmem:[#allocation2 + $0x61] sm:$0xff]  ;;  %s1372_s28 = sld [smem:[#allocation7 + $0x14]] }
 0x15f   : > { %v554_v57 = vadd.f32 %v552_v43, %v546_v46  ;;  %298 = vst.msk [vmem:[#allocation2 + $0x80] sm:$0xff] %vm228_vm3, %v290_v55  ;;  %358 = vrot.lane.b32.xlu1 %v1879_v47, %s1624_s29  ;;  %v628_v43 = vld [vmem:[#allocation2 + $0x4d] sm:$0xff]  ;;  %v676_v28 = vld [vmem:[#allocation2 + $0x64] sm:$0xff]  ;;  %s1373_s3 = sld [smem:[#allocation7 + $0x1b]] }
 0x160   : > { %v561_v56 = vadd.f32 %v559_v42, %v553_v45  ;;  %356 = vrot.lane.b32.xlu0 %v1887_v58, %s1624_s29  ;;  %v621_v42 = vld [vmem:[#allocation2 + $0x54] sm:$0xff]  ;;  %v616_v45 = vmul.f32 %v614_v27, %v613_v35  ;;  %s1939_s29 = sld [smem:[#allocation7 + $0x19]]  ;;  %v631_v55 = vmul.f32 %v630_v41, %v628_v43  ;;  %v678_v27 = vstv %s1947_s6  ;;  %v684_v36 = vld [vmem:[#allocation2 + $0x65] sm:$0xff] }
 0x161   : > { %v562_v1 = vadd.f32 %v560_v52, %v554_v57  ;;  %v303_v6 = vpop.permute.xlu0 %302  ;;  %v301_v7 = vpop.permute.xlu1 %300  ;;  %v624_v53 = vmul.f32 %v622_v34, %v621_v42  ;;  %v692_v43 = vld [vmem:[#allocation2 + $0x66] sm:$0xff]  ;;  %s1378_s6 = sld [smem:[#allocation7 + $0x38]] }
 0x162   : > { %v569_v63 = vadd.f32 %v567_v50, %v561_v56  ;;  %311 = vst.msk [vmem:[#allocation2 + $0x98] sm:$0xff] %vm228_vm3, %v303_v6  ;;  %310 = vst.msk [vmem:[#allocation2 + $0x90] sm:$0xff] %vm228_vm3, %v301_v7  ;;  %v629_v50 = vld [vmem:[#allocation2 + $0x55] sm:$0xff]  ;;  %v646_v57 = vstv %s1922_s23  ;;  %s1374_s23 = sld [smem:[#allocation7 + $0x22]] }
 0x163   : > { %v570_v10 = vadd.f32 %v568_v2, %v562_v1  ;;  %369 = vrot.lane.b32.xlu1 %v1887_v58, %s1625_s7  ;;  %v637_v56 = vld [vmem:[#allocation2 + $0x56] sm:$0xff]  ;;  %v632_v62 = vmul.f32 %v630_v41, %v629_v50  ;;  %v645_v1 = vld [vmem:[#allocation2 + $0x68] sm:$0xff]  ;;  %v654_v2 = vstv %s1929_s4  ;;  %v647_v7 = vmul.f32 %v646_v57, %v644_v60  ;;  %s1375_s4 = sld [smem:[#allocation7 + $0x29]] }
 0x164   : > { %v577_v8 = vadd.f32 %v575_v0, %v569_v63  ;;  %367 = vrot.lane.b32.xlu0 %v1890_v59, %s1625_s7  ;;  %v639_v0 = vmul.f32 %v638_v49, %v636_v51  ;;  %v640_v5 = vmul.f32 %v638_v49, %v637_v56  ;;  %v648_v12 = vmul.f32 %v646_v57, %v645_v1  ;;  %v700_v50 = vld [vmem:[#allocation2 + $0x78] sm:$0xff] }
 0x165   : > { %v578_v17 = vadd.f32 %v576_v11, %v570_v10  ;;  %v305_v22 = vpop.permute.xlu1 %304  ;;  %v653_v10 = vld [vmem:[#allocation2 + $0x69] sm:$0xff]  ;;  %v655_v14 = vmul.f32 %v654_v2, %v652_v3  ;;  %v702_v49 = vstv %s1363_s8  ;;  %s1381_s8 = sld [smem:[#allocation7 + $0x4d]] }
 0x166   : > { %v585_v15 = vadd.f32 %v583_v9, %v577_v8  ;;  %312 = vst.msk [vmem:[#allocation2 + $0xa0] sm:$0x3f] %vm231_vm4, %v305_v22  ;;  %v662_v8 = vstv %s1932_s5  ;;  %v660_v9 = vld [vmem:[#allocation2 + $0x62] sm:$0xff]  ;;  %v656_v21 = vmul.f32 %v654_v2, %v653_v10  ;;  %v669_v22 = vld [vmem:[#allocation2 + $0x6b] sm:$0xff]  ;;  %v708_v56 = vld [vmem:[#allocation2 + $0x79] sm:$0xff]  ;;  %s1376_s5 = sld [smem:[#allocation7 + $0x30]] }
 0x167   : > { %v586_v24 = vadd.f32 %v584_v18, %v578_v17  ;;  %380 = vrot.lane.b32.xlu1 %v1890_v59, %s1626_s16  ;;  %v661_v17 = vld [vmem:[#allocation2 + $0x6a] sm:$0xff]  ;;  %v663_v20 = vmul.f32 %v662_v8, %v660_v9  ;;  %v709_v60 = vld [vmem:[#allocation2 + $0x81] sm:$0xff] }
 0x168   : > { %v593_v23 = vadd.f32 %v591_v16, %v585_v15  ;;  %371 = vrot.lane.b32.xlu0 %v1879_v47, %s1625_s7  ;;  %v670_v15 = vstv %s1939_s29  ;;  %s1955_s7 = sld [smem:[#allocation7 + $0x27]]  ;;  %v668_v16 = vld [vmem:[#allocation2 + $0x63] sm:$0xff] }
 0x169   : > { %v594_v30 = vadd.f32 %v592_v25, %v586_v24  ;;  %v671_v24 = vmul.f32 %v670_v15, %v668_v16  ;;  %v717_v3 = vld [vmem:[#allocation2 + $0x82] sm:$0xff]  ;;  %s1377_s29 = sld [smem:[#allocation7 + $0x31]] }
 0x16a   : > { %v601_v32 = vadd.f32 %v599_v26, %v593_v23  ;;  %v664_v26 = vmul.f32 %v662_v8, %v661_v17  ;;  %v725_v10 = vld [vmem:[#allocation2 + $0x83] sm:$0xff] }
 0x16b   : > { %v602_v37 = vadd.f32 %v600_v31, %v594_v30  ;;  %384 = vrot.lane.b32.xlu1 %v1879_v47, %s1626_s16  ;;  %v672_v31 = vmul.f32 %v670_v15, %v669_v22  ;;  %v733_v17 = vld [vmem:[#allocation2 + $0x84] sm:$0xff] }
 0x16c   : > { %v609_v39 = vadd.f32 %v607_v33, %v601_v32  ;;  %382 = vrot.lane.b32.xlu0 %v1887_v58, %s1626_s16  ;;  %s1962_s16 = sld [smem:[#allocation7 + $0x2e]]  ;;  %v677_v32 = vld [vmem:[#allocation2 + $0x6c] sm:$0xff]  ;;  %v679_v33 = vmul.f32 %v678_v27, %v676_v28  ;;  %v748_v28 = vld [vmem:[#allocation2 + $0x7e] sm:$0xff] }
 0x16d   : > { %v610_v44 = vadd.f32 %v608_v38, %v602_v37  ;;  %v680_v38 = vmul.f32 %v678_v27, %v677_v32  ;;  %v750_v27 = vstv %s1369_s20  ;;  %s1988_s20 = sld [smem:[#allocation7 + $0x47]] }
 0x16e   : > { %v617_v46 = vadd.f32 %v615_v40, %v609_v39  ;;  %v686_v35 = vstv %s1955_s7  ;;  %v685_v39 = vld [vmem:[#allocation2 + $0x6d] sm:$0xff]  ;;  %s1379_s7 = sld [smem:[#allocation7 + $0x3f]] }
 0x16f   : > { %v618_v52 = vadd.f32 %v616_v45, %v610_v44  ;;  %395 = vrot.lane.b32.xlu1 %v1887_v58, %s1627_s17  ;;  %v687_v40 = vmul.f32 %v686_v35, %v684_v36  ;;  %v688_v45 = vmul.f32 %v686_v35, %v685_v39  ;;  %v756_v35 = vld [vmem:[#allocation2 + $0x90] sm:$0xff] }
 0x170   : > { %v625_v54 = vadd.f32 %v623_v48, %v617_v46  ;;  %393 = vrot.lane.b32.xlu0 %v1890_v59, %s1627_s17 }
 0x171   : > { %v626_v61 = vadd.f32 %v624_v53, %v618_v52  ;;  %v701_v53 = vld [vmem:[#allocation2 + $0x80] sm:$0xff] }
 0x172   : > { %v633_v63 = vadd.f32 %v631_v55, %v625_v54  ;;  %v694_v42 = vstv %s1962_s16  ;;  %v704_v57 = vmul.f32 %v702_v49, %v701_v53  ;;  %s1380_s16 = sld [smem:[#allocation7 + $0x46]] }
 0x173   : > { %v634_v4 = vadd.f32 %v632_v62, %v626_v61  ;;  %406 = vrot.lane.b32.xlu1 %v1890_v59, %s1628_s26  ;;  %v693_v59 = vld [vmem:[#allocation2 + $0x6e] sm:$0xff]  ;;  %v695_v46 = vmul.f32 %v694_v42, %v692_v43 }
 0x174   : > { %v641_v6 = vadd.f32 %v639_v0, %v633_v63  ;;  %397 = vrot.lane.b32.xlu0 %v1879_v47, %s1627_s17  ;;  %s1364_s17 = sld [smem:[#allocation7 + $0xc]]  ;;  %v696_v52 = vmul.f32 %v694_v42, %v693_v59  ;;  %v718_v63 = vstv %s1365_s19  ;;  %v716_v0 = vld [vmem:[#allocation2 + $0x7a] sm:$0xff]  ;;  %v764_v42 = vld [vmem:[#allocation2 + $0x91] sm:$0xff] }
 0x175   : > { %v642_v11 = vadd.f32 %v640_v5, %v634_v4  ;;  %v719_v5 = vmul.f32 %v718_v63, %v716_v0  ;;  %v720_v8 = vmul.f32 %v718_v63, %v717_v3  ;;  %v788_v63 = vld [vmem:[#allocation2 + $0x94] sm:$0xff]  ;;  %s1976_s19 = sld [smem:[#allocation7 + $0x5b]] }
 0x176   : > { %v649_v13 = vadd.f32 %v647_v7, %v641_v6  ;;  %v726_v6 = vstv %s1366_s24  ;;  %v724_v7 = vld [vmem:[#allocation2 + $0x7b] sm:$0xff]  ;;  %s1978_s24 = sld [smem:[#allocation7 + $0x32]] }
 0x177   : > { %v650_v18 = vadd.f32 %v648_v12, %v642_v11  ;;  %410 = vrot.lane.b32.xlu1 %v1879_v47, %s1628_s26  ;;  %v727_v12 = vmul.f32 %v726_v6, %v724_v7  ;;  %v728_v15 = vmul.f32 %v726_v6, %v725_v10  ;;  %v796_v6 = vld [vmem:[#allocation2 + $0x95] sm:$0xff] }
 0x178   : > { %v657_v19 = vadd.f32 %v655_v14, %v649_v13  ;;  %408 = vrot.lane.b32.xlu0 %v1887_v58, %s1628_s26  ;;  %v703_v58 = vmul.f32 %v702_v49, %v700_v50  ;;  %s1367_s26 = sld [smem:[#allocation7 + $0x21]]  ;;  %v732_v14 = vld [vmem:[#allocation2 + $0x7c] sm:$0xff]  ;;  %v772_v49 = vld [vmem:[#allocation2 + $0x92] sm:$0xff] }
 0x179   : > { %v658_v25 = vadd.f32 %v656_v21, %v650_v18  ;;  %v740_v21 = vld [vmem:[#allocation2 + $0x7d] sm:$0xff] }
 0x17a   : > { %v665_v23 = vadd.f32 %v663_v20, %v657_v19  ;;  %v710_v55 = vstv %s1364_s17  ;;  %v742_v20 = vstv %s1368_s25  ;;  %s1974_s17 = sld [smem:[#allocation7 + $0x54]] }
 0x17b   : > { %v666_v30 = vadd.f32 %v664_v26, %v658_v25  ;;  %v711_v62 = vmul.f32 %v710_v55, %v708_v56  ;;  %v712_v1 = vmul.f32 %v710_v55, %v709_v60  ;;  %v743_v26 = vmul.f32 %v742_v20, %v740_v21  ;;  %v780_v55 = vld [vmem:[#allocation2 + $0x93] sm:$0xff]  ;;  %s1984_s25 = sld [smem:[#allocation7 + $0x40]] }
 0x17c   : > { %v673_v29 = vadd.f32 %v671_v24, %v665_v23  ;;  %v741_v24 = vld [vmem:[#allocation2 + $0x85] sm:$0xff] }
 0x17d   : > { %v674_v34 = vadd.f32 %v672_v31, %v666_v30  ;;  %v749_v31 = vld [vmem:[#allocation2 + $0x86] sm:$0xff] }
 0x17e   : > { %v681_v37 = vadd.f32 %v679_v33, %v673_v29  ;;  %v734_v13 = vstv %s1367_s26  ;;  %v744_v29 = vmul.f32 %v742_v20, %v741_v24  ;;  %v751_v33 = vmul.f32 %v750_v27, %v748_v28  ;;  %v812_v20 = vld [vmem:[#allocation2 + $0xa8] sm:$0xff]  ;;  %s1981_s26 = sld [smem:[#allocation7 + $0x39]] }
 0x17f   : > { %v682_v41 = vadd.f32 %v680_v38, %v674_v34  ;;  %v735_v19 = vmul.f32 %v734_v13, %v732_v14  ;;  %v736_v22 = vmul.f32 %v734_v13, %v733_v17  ;;  %v758_v34 = vstv %s1370_s27  ;;  %v757_v38 = vld [vmem:[#allocation2 + $0x98] sm:$0xff]  ;;  %s1992_s27 = sld [smem:[#allocation7 + $0x4e]] }
 0x180   : > { %v689_v44 = vadd.f32 %v687_v40, %v681_v37  ;;  %v752_v36 = vmul.f32 %v750_v27, %v749_v31  ;;  %v759_v40 = vmul.f32 %v758_v34, %v756_v35  ;;  %v760_v43 = vmul.f32 %v758_v34, %v757_v38  ;;  %v804_v13 = vld [vmem:[#allocation2 + $0x96] sm:$0xff]  ;;  %v820_v27 = vld [vmem:[#allocation2 + $0xa9] sm:$0xff] }
 0x181   : > { %v690_v48 = vadd.f32 %v688_v45, %v682_v41  ;;  %v766_v41 = vstv %s1371_s30  ;;  %v765_v45 = vld [vmem:[#allocation2 + $0x99] sm:$0xff]  ;;  %v828_v34 = vld [vmem:[#allocation2 + $0xaa] sm:$0xff]  ;;  %s1996_s30 = sld [smem:[#allocation7 + $0x55]] }
 0x182   : > { %v697_v51 = vadd.f32 %v695_v46, %v689_v44  ;;  %v767_v46 = vmul.f32 %v766_v41, %v764_v42 }
 0x183   : > { %v698_v54 = vadd.f32 %v696_v52, %v690_v48  ;;  %v774_v48 = vstv %s1372_s28  ;;  %v773_v52 = vld [vmem:[#allocation2 + $0x9a] sm:$0xff]  ;;  %s2000_s28 = sld [smem:[#allocation7 + $0x5c]] }
 0x184   : > { %v705_v47 = vadd.f32 %v703_v58, %v697_v51  ;;  %v768_v51 = vmul.f32 %v766_v41, %v765_v45  ;;  %v775_v53 = vmul.f32 %v774_v48, %v772_v49  ;;  %v836_v41 = vld [vmem:[#allocation2 + $0xab] sm:$0xff] }
 0x185   : > { %v706_v61 = vadd.f32 %v704_v57, %v698_v54  ;;  %v782_v54 = vstv %s1373_s3  ;;  %v781_v57 = vld [vmem:[#allocation2 + $0x9b] sm:$0xff]  ;;  %s2004_s3 = sld [smem:[#allocation7 + $0x33]] }
 0x186   : > { %v713_v2 = vadd.f32 %v711_v62, %v705_v47  ;;  %v776_v47 = vmul.f32 %v774_v48, %v773_v52  ;;  %v783_v60 = vmul.f32 %v782_v54, %v780_v55  ;;  %v790_v62 = vstv %s1374_s23  ;;  %v844_v48 = vld [vmem:[#allocation2 + $0xac] sm:$0xff]  ;;  %s2008_s23 = sld [smem:[#allocation7 + $0x3a]] }
 0x187   : > { %v714_v4 = vadd.f32 %v712_v1, %v706_v61  ;;  %v784_v1 = vmul.f32 %v782_v54, %v781_v57  ;;  %v791_v3 = vmul.f32 %v790_v62, %v788_v63  ;;  %v852_v54 = vld [vmem:[#allocation2 + $0xad] sm:$0xff]  ;;  %v862_v63 = vstv %s1976_s19  ;;  %s2044_s19 = sld [smem:[#allocation7 + $0x49]] }
 0x188   : > { %v721_v9 = vadd.f32 %v719_v5, %v713_v2  ;;  %v789_v2 = vld [vmem:[#allocation2 + $0x9c] sm:$0xff]  ;;  %v798_v5 = vstv %s1375_s4  ;;  %s2012_s4 = sld [smem:[#allocation7 + $0x41]] }
 0x189   : > { %v722_v11 = vadd.f32 %v720_v8, %v714_v4  ;;  %v792_v8 = vmul.f32 %v790_v62, %v789_v2  ;;  %v799_v10 = vmul.f32 %v798_v5, %v796_v6  ;;  %v861_v6 = vld [vmem:[#allocation2 + $0xb6] sm:$0xff] }
 0x18a   : > { %v729_v16 = vadd.f32 %v727_v12, %v721_v9  ;;  %v797_v9 = vld [vmem:[#allocation2 + $0x9d] sm:$0xff]  ;;  %v806_v12 = vstv %s1376_s5  ;;  %s2016_s5 = sld [smem:[#allocation7 + $0x48]] }
 0x18b   : > { %v730_v18 = vadd.f32 %v728_v15, %v722_v11  ;;  %v800_v15 = vmul.f32 %v798_v5, %v797_v9  ;;  %v807_v17 = vmul.f32 %v806_v12, %v804_v13  ;;  %v870_v5 = vstv %s1978_s24  ;;  %s2048_s24 = sld [smem:[#allocation7 + $0x50]] }
 0x18c   : > { %v737_v23 = vadd.f32 %v735_v19, %v729_v16  ;;  %v805_v16 = vld [vmem:[#allocation2 + $0x9e] sm:$0xff]  ;;  %v814_v19 = vstv %s1377_s29  ;;  %s2020_s29 = sld [smem:[#allocation7 + $0x4f]] }
 0x18d   : > { %v738_v25 = vadd.f32 %v736_v22, %v730_v18  ;;  %v808_v22 = vmul.f32 %v806_v12, %v805_v16  ;;  %v815_v24 = vmul.f32 %v814_v19, %v812_v20 }
 0x18e   : > { %v745_v30 = vadd.f32 %v743_v26, %v737_v23  ;;  %v813_v23 = vld [vmem:[#allocation2 + $0xb0] sm:$0xff]  ;;  %v822_v26 = vstv %s1378_s6  ;;  %s2024_s6 = sld [smem:[#allocation7 + $0x56]] }
 0x18f   : > { %v746_v32 = vadd.f32 %v744_v29, %v738_v25  ;;  %v816_v28 = vmul.f32 %v814_v19, %v813_v23  ;;  %v823_v31 = vmul.f32 %v822_v26, %v820_v27 }
 0x190   : > { %v753_v37 = vadd.f32 %v751_v33, %v745_v30  ;;  %v821_v30 = vld [vmem:[#allocation2 + $0xb1] sm:$0xff]  ;;  %v830_v33 = vstv %s1379_s7  ;;  %s2028_s7 = sld [smem:[#allocation7 + $0x5d]] }
 0x191   : > { %v754_v39 = vadd.f32 %v752_v36, %v746_v32  ;;  %v824_v35 = vmul.f32 %v822_v26, %v821_v30  ;;  %v831_v38 = vmul.f32 %v830_v33, %v828_v34  ;;  %v902_v34 = vstv %s1992_s27  ;;  %s2061_s27 = sld [smem:[#allocation7 + $0x3c]] }
 0x192   : > { %v761_v44 = vadd.f32 %v759_v40, %v753_v37  ;;  %v829_v37 = vld [vmem:[#allocation2 + $0xb2] sm:$0xff]  ;;  %v838_v40 = vstv %s1380_s16  ;;  %s2032_s16 = sld [smem:[#allocation7 + $0x34]] }
 0x193   : > { %v762_v59 = vadd.f32 %v760_v43, %v754_v39  ;;  %v832_v42 = vmul.f32 %v830_v33, %v829_v37  ;;  %v839_v45 = vmul.f32 %v838_v40, %v836_v41  ;;  %v910_v41 = vstv %s1996_s30  ;;  %s2064_s30 = sld [smem:[#allocation7 + $0x43]] }
 0x194   : > { %v769_v50 = vadd.f32 %v767_v46, %v761_v44  ;;  %v837_v44 = vld [vmem:[#allocation2 + $0xb3] sm:$0xff]  ;;  %v846_v46 = vstv %s1381_s8  ;;  %s2036_s8 = sld [smem:[#allocation7 + $0x3b]] }
 0x195   : > { %v770_v58 = vadd.f32 %v768_v51, %v762_v59  ;;  %v840_v49 = vmul.f32 %v838_v40, %v837_v44  ;;  %v845_v51 = vld [vmem:[#allocation2 + $0xb4] sm:$0xff]  ;;  %v847_v52 = vmul.f32 %v846_v46, %v844_v48 }
 0x196   : > { %v777_v56 = vadd.f32 %v775_v53, %v769_v50 }
 0x197   : > { %v778_v61 = vadd.f32 %v776_v47, %v770_v58  ;;  %v854_v58 = vstv %s1974_s17  ;;  %s2040_s17 = sld [smem:[#allocation7 + $0x42]] }
 0x198   : > { %v785_v0 = vadd.f32 %v783_v60, %v777_v56  ;;  %v848_v56 = vmul.f32 %v846_v46, %v845_v51  ;;  %v853_v60 = vld [vmem:[#allocation2 + $0xb5] sm:$0xff] }
 0x199   : > { %v786_v4 = vadd.f32 %v784_v1, %v778_v61  ;;  %v855_v61 = vmul.f32 %v854_v58, %v852_v54 }
 0x19a   : > { %v793_v7 = vadd.f32 %v791_v3, %v785_v0  ;;  %v860_v0 = vld [vmem:[#allocation2 + $0xae] sm:$0xff]  ;;  %v856_v3 = vmul.f32 %v854_v58, %v853_v60 }
 0x19b   : > { %v794_v11 = vadd.f32 %v792_v8, %v786_v4 }
 0x19c   : > { %v801_v14 = vadd.f32 %v799_v10, %v793_v7  ;;  %v863_v7 = vmul.f32 %v862_v63, %v860_v0  ;;  %v878_v10 = vstv %s1981_s26  ;;  %s2052_s26 = sld [smem:[#allocation7 + $0x57]] }
 0x19d   : > { %v802_v18 = vadd.f32 %v800_v15, %v794_v11 }
 0x19e   : > { %v809_v21 = vadd.f32 %v807_v17, %v801_v14  ;;  %v864_v14 = vmul.f32 %v862_v63, %v861_v6 }
 0x19f   : > { %v810_v25 = vadd.f32 %v808_v22, %v802_v18  ;;  %v886_v18 = vstv %s1984_s25  ;;  %s2055_s25 = sld [smem:[#allocation7 + $0x5e]] }
 0x1a0   : > { %v817_v29 = vadd.f32 %v815_v24, %v809_v21  ;;  %v894_v24 = vstv %s1988_s20  ;;  %s2058_s20 = sld [smem:[#allocation7 + $0x35]] }
 0x1a1   : > { %v818_v32 = vadd.f32 %v816_v28, %v810_v25 }
 0x1a2   : > { %v825_v36 = vadd.f32 %v823_v31, %v817_v29 }
 0x1a3   : > { %v826_v39 = vadd.f32 %v824_v35, %v818_v32 }
 0x1a4   : > { %v833_v43 = vadd.f32 %v831_v38, %v825_v36 }
 0x1a5   : > { %v834_v59 = vadd.f32 %v832_v42, %v826_v39 }
 0x1a6   : > { %v841_v50 = vadd.f32 %v839_v45, %v833_v43 }
 0x1a7   : > { %v842_v53 = vadd.f32 %v840_v49, %v834_v59 }
 0x1a8   : > { %v849_v47 = vadd.f32 %v847_v52, %v841_v50  ;;  %v918_v50 = vstv %s2000_s28  ;;  %s2067_s28 = sld [smem:[#allocation7 + $0x4a]] }
 0x1a9   : > { %v850_v62 = vadd.f32 %v848_v56, %v842_v53 }
 0x1aa   : > { %v857_v2 = vadd.f32 %v855_v61, %v849_v47  ;;  %v926_v47 = vstv %s2004_s3  ;;  %s2070_s3 = sld [smem:[#allocation7 + $0x51]] }
 0x1ab   : > { %v858_v8 = vadd.f32 %v856_v3, %v850_v62 }
 0x1ac   : > { %v865_v12 = vadd.f32 %v863_v7, %v857_v2  ;;  %v934_v2 = vstv %s2008_s23  ;;  %s2073_s23 = sld [smem:[#allocation7 + $0x58]] }
 0x1ad   : > { %v866_v22 = vadd.f32 %v864_v14, %v858_v8 }
 0x1c9   : > { %v344_v57 = vpop.permute.xlu1 %343 }
 0x1ca   : > { %v342_v55 = vpop.permute.xlu0 %341  ;;  %352 = vst.msk [vmem:[#allocation2 + $0xc8] sm:$0xff] %vm228_vm3, %v344_v57 }
 0x1cb   : > { %351 = vst.msk [vmem:[#allocation2 + $0xc0] sm:$0xff] %vm228_vm3, %v342_v55 }
 0x1cd   : > { %v355_v4 = vpop.permute.xlu1 %354 }
 0x1ce   : > { %v346_v1 = vpop.permute.xlu0 %345  ;;  %364 = vst.msk [vmem:[#allocation2 + $0xd8] sm:$0xff] %vm228_vm3, %v355_v4 }
 0x1cf   : > { %353 = vst.msk [vmem:[#allocation2 + $0xd0] sm:$0x3f] %vm231_vm4, %v346_v1 }
 0x1d1   : > { %v869_v15 = vld [vmem:[#allocation2 + $0xc8] sm:$0xff]  ;;  %v359_v17 = vpop.permute.xlu1 %358 }
 0x1d2   : > { %v868_v9 = vld [vmem:[#allocation2 + $0xc0] sm:$0xff]  ;;  %v357_v11 = vpop.permute.xlu0 %356  ;;  %v872_v19 = vmul.f32 %v870_v5, %v869_v15  ;;  %366 = vst.msk [vmem:[#allocation2 + $0xe8] sm:$0x3f] %vm231_vm4, %v359_v17 }
 0x1d3   : > { %v871_v13 = vmul.f32 %v870_v5, %v868_v9  ;;  %v876_v16 = vld [vmem:[#allocation2 + $0xc1] sm:$0xff]  ;;  %365 = vst.msk [vmem:[#allocation2 + $0xe0] sm:$0xff] %vm228_vm3, %v357_v11  ;;  %v942_v9 = vstv %s2012_s4  ;;  %s2076_s4 = sld [smem:[#allocation7 + $0x5f]] }
 0x1d4   : > { %v884_v20 = vld [vmem:[#allocation2 + $0xc2] sm:$0xff]  ;;  %v879_v23 = vmul.f32 %v878_v10, %v876_v16  ;;  %v874_v29 = vadd.f32 %v872_v19, %v866_v22 }
 0x1d5   : > { %v873_v21 = vadd.f32 %v871_v13, %v865_v12  ;;  %v892_v25 = vld [vmem:[#allocation2 + $0xc3] sm:$0xff]  ;;  %v887_v31 = vmul.f32 %v886_v18, %v884_v20  ;;  %v370_v33 = vpop.permute.xlu1 %369  ;;  %v924_v57 = vld [vmem:[#allocation2 + $0xd8] sm:$0xff] }
 0x1d6   : > { %v877_v26 = vld [vmem:[#allocation2 + $0xc9] sm:$0xff]  ;;  %v368_v28 = vpop.permute.xlu0 %367  ;;  %378 = vst.msk [vmem:[#allocation2 + $0xf8] sm:$0xff] %vm228_vm3, %v370_v33  ;;  %v895_v38 = vmul.f32 %v894_v24, %v892_v25  ;;  %v927_v8 = vmul.f32 %v926_v47, %v924_v57  ;;  %v958_v25 = vstv %s2020_s29  ;;  %s2082_s29 = sld [smem:[#allocation7 + $0x3d]] }
 0x1d7   : > { %v885_v27 = vld [vmem:[#allocation2 + $0xca] sm:$0xff]  ;;  %v881_v30 = vadd.f32 %v879_v23, %v873_v21  ;;  %v880_v32 = vmul.f32 %v878_v10, %v877_v26  ;;  %377 = vst.msk [vmem:[#allocation2 + $0xf0] sm:$0xff] %vm228_vm3, %v368_v28 }
 0x1d8   : > { %v900_v35 = vld [vmem:[#allocation2 + $0xc4] sm:$0xff]  ;;  %v888_v40 = vmul.f32 %v886_v18, %v885_v27  ;;  %v901_v43 = vld [vmem:[#allocation2 + $0xcc] sm:$0xff]  ;;  %v950_v18 = vstv %s2016_s5  ;;  %s2079_s5 = sld [smem:[#allocation7 + $0x36]] }
 0x1d9   : > { %v893_v36 = vld [vmem:[#allocation2 + $0xcb] sm:$0xff]  ;;  %v889_v37 = vadd.f32 %v887_v31, %v881_v30  ;;  %v882_v39 = vadd.f32 %v880_v32, %v874_v29  ;;  %v903_v59 = vmul.f32 %v902_v34, %v900_v35  ;;  %v381_v49 = vpop.permute.xlu1 %380  ;;  %v904_v55 = vmul.f32 %v902_v34, %v901_v43 }
 0x1da   : > { %v908_v42 = vld [vmem:[#allocation2 + $0xc5] sm:$0xff]  ;;  %v372_v44 = vpop.permute.xlu0 %371  ;;  %v896_v48 = vmul.f32 %v894_v24, %v893_v36  ;;  %v909_v52 = vld [vmem:[#allocation2 + $0xcd] sm:$0xff]  ;;  %390 = vst.msk [vmem:[#allocation2 + $0x108] sm:$0xff] %vm228_vm3, %v381_v49  ;;  %v932_v4 = vld [vmem:[#allocation2 + $0xd9] sm:$0xff]  ;;  %v966_v34 = vstv %s2024_s6  ;;  %s2085_s6 = sld [smem:[#allocation7 + $0x44]] }
 0x1db   : > { %v897_v45 = vadd.f32 %v895_v38, %v889_v37  ;;  %v890_v46 = vadd.f32 %v888_v40, %v882_v39  ;;  %379 = vst.msk [vmem:[#allocation2 + $0x100] sm:$0x3f] %vm231_vm4, %v372_v44  ;;  %v916_v51 = vld [vmem:[#allocation2 + $0xc6] sm:$0xff]  ;;  %v911_v58 = vmul.f32 %v910_v41, %v908_v42  ;;  %v917_v56 = vld [vmem:[#allocation2 + $0xce] sm:$0xff]  ;;  %v912_v0 = vmul.f32 %v910_v41, %v909_v52  ;;  %v940_v10 = vld [vmem:[#allocation2 + $0xda] sm:$0xff] }
 0x1dc   : > { %v919_v62 = vmul.f32 %v918_v50, %v916_v51  ;;  %v925_v3 = vld [vmem:[#allocation2 + $0xe0] sm:$0xff]  ;;  %v920_v7 = vmul.f32 %v918_v50, %v917_v56  ;;  %v935_v16 = vmul.f32 %v934_v2, %v932_v4  ;;  %v943_v23 = vmul.f32 %v942_v9, %v940_v10 }
 0x1dd   : > { %v905_v53 = vadd.f32 %v903_v59, %v897_v45  ;;  %v898_v54 = vadd.f32 %v896_v48, %v890_v46  ;;  %v385_v1 = vpop.permute.xlu1 %384  ;;  %v933_v11 = vld [vmem:[#allocation2 + $0xe1] sm:$0xff]  ;;  %v928_v15 = vmul.f32 %v926_v47, %v925_v3  ;;  %v974_v41 = vstv %s2028_s7  ;;  %v981_v47 = vld [vmem:[#allocation2 + $0xf8] sm:$0xff]  ;;  %s2088_s7 = sld [smem:[#allocation7 + $0x4b]] }
 0x1de   : > { %v383_v60 = vpop.permute.xlu0 %382  ;;  %392 = vst.msk [vmem:[#allocation2 + $0x118] sm:$0x3f] %vm231_vm4, %v385_v1  ;;  %v948_v19 = vld [vmem:[#allocation2 + $0xdb] sm:$0xff]  ;;  %v936_v24 = vmul.f32 %v934_v2, %v933_v11  ;;  %v949_v27 = vld [vmem:[#allocation2 + $0xe3] sm:$0xff]  ;;  %v982_v51 = vstv %s2032_s16  ;;  %v980_v52 = vld [vmem:[#allocation2 + $0xf0] sm:$0xff]  ;;  %v990_v56 = vstv %s2036_s8  ;;  %s2091_s16 = sld [smem:[#allocation7 + $0x52]] }
 0x1df   : > { %v913_v61 = vadd.f32 %v911_v58, %v905_v53  ;;  %v906_v63 = vadd.f32 %v904_v55, %v898_v54  ;;  %391 = vst.msk [vmem:[#allocation2 + $0x110] sm:$0xff] %vm228_vm3, %v383_v60  ;;  %v941_v20 = vld [vmem:[#allocation2 + $0xe2] sm:$0xff]  ;;  %v951_v30 = vmul.f32 %v950_v18, %v948_v19  ;;  %v952_v40 = vmul.f32 %v950_v18, %v949_v27  ;;  %v988_v57 = vld [vmem:[#allocation2 + $0xf1] sm:$0xff]  ;;  %s2094_s8 = sld [smem:[#allocation7 + $0x59]] }
 0x1e0   : > { %v956_v26 = vld [vmem:[#allocation2 + $0xdc] sm:$0xff]  ;;  %v944_v32 = vmul.f32 %v942_v9, %v941_v20  ;;  %v957_v36 = vld [vmem:[#allocation2 + $0xe4] sm:$0xff]  ;;  %v996_v1 = vld [vmem:[#allocation2 + $0xf2] sm:$0xff] }
 0x1e1   : > { %v921_v5 = vadd.f32 %v919_v62, %v913_v61  ;;  %v914_v6 = vadd.f32 %v912_v0, %v906_v63  ;;  %v396_v17 = vpop.permute.xlu1 %395  ;;  %v964_v35 = vld [vmem:[#allocation2 + $0xdd] sm:$0xff]  ;;  %v959_v38 = vmul.f32 %v958_v25, %v956_v26  ;;  %v965_v43 = vld [vmem:[#allocation2 + $0xe5] sm:$0xff]  ;;  %v960_v48 = vmul.f32 %v958_v25, %v957_v36 }
 0x1e2   : > { %v394_v12 = vpop.permute.xlu0 %393  ;;  %404 = vst.msk [vmem:[#allocation2 + $0x128] sm:$0xff] %vm228_vm3, %v396_v17  ;;  %v972_v42 = vld [vmem:[#allocation2 + $0xde] sm:$0xff]  ;;  %v967_v59 = vmul.f32 %v966_v34, %v964_v35  ;;  %v973_v50 = vld [vmem:[#allocation2 + $0xe6] sm:$0xff]  ;;  %v968_v55 = vmul.f32 %v966_v34, %v965_v43  ;;  %v983_v63 = vmul.f32 %v982_v51, %v980_v52  ;;  %v998_v0 = vstv %s2040_s17  ;;  %s2097_s17 = sld [smem:[#allocation7 + $0x60]] }
 0x1e3   : > { %v922_v13 = vadd.f32 %v920_v7, %v914_v6  ;;  %v929_v14 = vadd.f32 %v927_v8, %v921_v5  ;;  %403 = vst.msk [vmem:[#allocation2 + $0x120] sm:$0xff] %vm228_vm3, %v394_v12  ;;  %v975_v58 = vmul.f32 %v974_v41, %v972_v42  ;;  %v976_v62 = vmul.f32 %v974_v41, %v973_v50  ;;  %v989_v2 = vld [vmem:[#allocation2 + $0xf9] sm:$0xff] }
 0x1e4   : > { %v984_v5 = vmul.f32 %v982_v51, %v981_v47  ;;  %v991_v6 = vmul.f32 %v990_v56, %v988_v57  ;;  %v1006_v7 = vstv %s2044_s19  ;;  %v1004_v8 = vld [vmem:[#allocation2 + $0xf3] sm:$0xff]  ;;  %v999_v12 = vmul.f32 %v998_v0, %v996_v1  ;;  %v1029_v35 = vld [vmem:[#allocation2 + $0xfe] sm:$0xff]  ;;  %s2100_s19 = sld [smem:[#allocation7 + $0x37]] }
 0x1e5   : > { %v930_v21 = vadd.f32 %v928_v15, %v922_v13  ;;  %v937_v22 = vadd.f32 %v935_v16, %v929_v14  ;;  %v407_v33 = vpop.permute.xlu1 %406  ;;  %v997_v9 = vld [vmem:[#allocation2 + $0xfa] sm:$0xff]  ;;  %v992_v13 = vmul.f32 %v990_v56, %v989_v2  ;;  %v1014_v14 = vstv %s2048_s24  ;;  %s2103_s24 = sld [smem:[#allocation7 + $0x3e]] }
 0x1e6   : > { %v398_v28 = vpop.permute.xlu0 %397  ;;  %416 = vst.msk [vmem:[#allocation2 + $0x138] sm:$0xff] %vm228_vm3, %v407_v33  ;;  %v1012_v15 = vld [vmem:[#allocation2 + $0xf4] sm:$0xff]  ;;  %v1007_v18 = vmul.f32 %v1006_v7, %v1004_v8  ;;  %v1000_v20 = vmul.f32 %v998_v0, %v997_v9  ;;  %v1038_v36 = vstv %s2058_s20  ;;  %v1046_v42 = vstv %s2061_s27  ;;  %v1052_v50 = vld [vmem:[#allocation2 + $0x10a] sm:$0xff]  ;;  %s2112_s20 = sld [smem:[#allocation7 + $0x53]] }
 0x1e7   : > { %v945_v29 = vadd.f32 %v943_v23, %v937_v22  ;;  %v938_v31 = vadd.f32 %v936_v24, %v930_v21  ;;  %405 = vst.msk [vmem:[#allocation2 + $0x130] sm:$0x3f] %vm231_vm4, %v398_v28  ;;  %v1005_v16 = vld [vmem:[#allocation2 + $0xfb] sm:$0xff]  ;;  %v1022_v21 = vstv %s2052_s26  ;;  %v1015_v25 = vmul.f32 %v1014_v14, %v1012_v15  ;;  %v1037_v43 = vld [vmem:[#allocation2 + $0x110] sm:$0xff]  ;;  %s2106_s26 = sld [smem:[#allocation7 + $0x45]] }
 0x1e8   : > { %v1020_v22 = vld [vmem:[#allocation2 + $0xf5] sm:$0xff]  ;;  %v1008_v27 = vmul.f32 %v1006_v7, %v1005_v16  ;;  %v1030_v28 = vstv %s2055_s25  ;;  %v1060_v56 = vld [vmem:[#allocation2 + $0x10b] sm:$0xff]  ;;  %s2109_s25 = sld [smem:[#allocation7 + $0x4c]] }
 0x1e9   : > { %v953_v37 = vadd.f32 %v951_v30, %v945_v29  ;;  %v946_v39 = vadd.f32 %v944_v32, %v938_v31  ;;  %v411_v49 = vpop.permute.xlu1 %410  ;;  %v1013_v23 = vld [vmem:[#allocation2 + $0xfc] sm:$0xff]  ;;  %v1023_v32 = vmul.f32 %v1022_v21, %v1020_v22  ;;  %v1045_v51 = vld [vmem:[#allocation2 + $0x111] sm:$0xff]  ;;  %s2115_s27 = sld [smem:[#allocation7 + $0x5a]] }
 0x1ea   : > { %v409_v44 = vpop.permute.xlu0 %408  ;;  %418 = vst.msk [vmem:[#allocation2 + $0x148] sm:$0x3f] %vm231_vm4, %v411_v49  ;;  %v1028_v29 = vld [vmem:[#allocation2 + $0xf6] sm:$0xff]  ;;  %v1016_v34 = vmul.f32 %v1014_v14, %v1013_v23  ;;  %v1054_v49 = vstv %s2064_s30  ;;  %v1068_v0 = vld [vmem:[#allocation2 + $0x10c] sm:$0xff]  ;;  %v1092_v22 = vld [vmem:[#allocation2 + $0x120] sm:$0xff]  ;;  %s2118_s30 = sld [smem:[#allocation7 + $0x61]] }
 0x1eb   : > { %v961_v45 = vadd.f32 %v959_v38, %v953_v37  ;;  %v954_v46 = vadd.f32 %v952_v40, %v946_v39  ;;  %417 = vst.msk [vmem:[#allocation2 + $0x140] sm:$0xff] %vm228_vm3, %v409_v44  ;;  %v1021_v30 = vld [vmem:[#allocation2 + $0xfd] sm:$0xff]  ;;  %v1036_v37 = vld [vmem:[#allocation2 + $0x108] sm:$0xff]  ;;  %v1031_v39 = vmul.f32 %v1030_v28, %v1028_v29  ;;  %v1053_v47 = vld [vmem:[#allocation2 + $0x112] sm:$0xff] }
 0x1ec   : > { %v1024_v41 = vmul.f32 %v1022_v21, %v1021_v30  ;;  %v1044_v44 = vld [vmem:[#allocation2 + $0x109] sm:$0xff]  ;;  %v1061_v1 = vld [vmem:[#allocation2 + $0x113] sm:$0xff]  ;;  %v1094_v21 = vstv %s2079_s5  ;;  %v1100_v29 = vld [vmem:[#allocation2 + $0x121] sm:$0xff] }
 0x1ed   : > { %v969_v53 = vadd.f32 %v967_v59, %v961_v45  ;;  %v962_v54 = vadd.f32 %v960_v48, %v954_v46  ;;  %v1032_v46 = vmul.f32 %v1030_v28, %v1029_v35  ;;  %v1039_v48 = vmul.f32 %v1038_v36, %v1036_v37  ;;  %v1076_v7 = vld [vmem:[#allocation2 + $0x10d] sm:$0xff]  ;;  %v1077_v15 = vld [vmem:[#allocation2 + $0x115] sm:$0xff]  ;;  %v1108_v35 = vld [vmem:[#allocation2 + $0x122] sm:$0xff] }
 0x1ee   : > { %v1069_v8 = vld [vmem:[#allocation2 + $0x114] sm:$0xff]  ;;  %v1093_v28 = vld [vmem:[#allocation2 + $0x128] sm:$0xff] }
 0x1ef   : > { %v977_v60 = vadd.f32 %v975_v58, %v969_v53  ;;  %v970_v61 = vadd.f32 %v968_v55, %v962_v54  ;;  %v1040_v58 = vmul.f32 %v1038_v36, %v1037_v43  ;;  %v1047_v54 = vmul.f32 %v1046_v42, %v1044_v44  ;;  %v1084_v14 = vld [vmem:[#allocation2 + $0x10e] sm:$0xff] }
 0x1f0   : > { %v1062_v55 = vstv %s2067_s28  ;;  %v1101_v36 = vld [vmem:[#allocation2 + $0x129] sm:$0xff]  ;;  %s1322_s28 = sshll.u32 %s1767_s14, 4 }
 0x1f1   : > { %v978_v3 = vadd.f32 %v976_v62, %v970_v61  ;;  %v985_v4 = vadd.f32 %v983_v63, %v977_v60  ;;  %v1055_v61 = vmul.f32 %v1054_v49, %v1052_v50  ;;  %v1048_v62 = vmul.f32 %v1046_v42, %v1045_v51  ;;  %v1116_v42 = vld [vmem:[#allocation2 + $0x123] sm:$0xff]  ;;  %v1117_v50 = vld [vmem:[#allocation2 + $0x12b] sm:$0xff] }
 0x1f2   : > { %v1070_v63 = vstv %s2070_s3  ;;  %v1109_v43 = vld [vmem:[#allocation2 + $0x12a] sm:$0xff]  ;;  %s1432_s3 = sshll.u32 %s1668_s13, 8  ;;  %s1214_s13 = scalar_lea.sflag [#allocation5], %s1767_s14 }
 0x1f3   : > { %v986_v10 = vadd.f32 %v984_v5, %v978_v3  ;;  %v993_v11 = vadd.f32 %v991_v6, %v985_v4  ;;  %v1063_v3 = vmul.f32 %v1062_v55, %v1060_v56  ;;  %v1056_v5 = vmul.f32 %v1054_v49, %v1053_v47  ;;  %v1124_v49 = vld [vmem:[#allocation2 + $0x124] sm:$0xff]  ;;  %v1125_v56 = vld [vmem:[#allocation2 + $0x12c] sm:$0xff] }
 0x1f4   : > { %v1078_v6 = vstv %s2073_s23  ;;  %s175_s23 = scalar_lea.vmem [#allocation8], %s1322_s28 }
 0x1f5   : > { %v1001_v17 = vadd.f32 %v999_v12, %v993_v11  ;;  %v994_v19 = vadd.f32 %v992_v13, %v986_v10  ;;  %v1071_v10 = vmul.f32 %v1070_v63, %v1068_v0  ;;  %v1064_v12 = vmul.f32 %v1062_v55, %v1061_v1  ;;  %v1132_v55 = vld [vmem:[#allocation2 + $0x125] sm:$0xff]  ;;  %v1133_v0 = vld [vmem:[#allocation2 + $0x12d] sm:$0xff] }
 0x1f6   : > { %v1086_v13 = vstv %s2076_s4  ;;  %s1227_s4 = sshll.u32 %s175_s23, 4  ;;  %s2131_s4 = int_to_ptr.vmem [resolvable:$true] %s1227_s4 }
 0x1f7   : > { %v1009_v24 = vadd.f32 %v1007_v18, %v1001_v17  ;;  %v1002_v26 = vadd.f32 %v1000_v20, %v994_v19  ;;  %v1079_v17 = vmul.f32 %v1078_v6, %v1076_v7  ;;  %v1072_v19 = vmul.f32 %v1070_v63, %v1069_v8  ;;  %v1085_v20 = vld [vmem:[#allocation2 + $0x116] sm:$0xff]  ;;  %v1140_v63 = vld [vmem:[#allocation2 + $0x126] sm:$0xff] }
 0x1f8   : > { %v1148_v7 = vld [vmem:[#allocation2 + $0x138] sm:$0xff] }
 0x1f9   : > { %v1017_v31 = vadd.f32 %v1015_v25, %v1009_v24  ;;  %v1010_v33 = vadd.f32 %v1008_v27, %v1002_v26  ;;  %v1087_v24 = vmul.f32 %v1086_v13, %v1084_v14  ;;  %v1080_v26 = vmul.f32 %v1078_v6, %v1077_v15 }
 0x1fa   : > { %v1102_v27 = vstv %s2082_s29  ;;  %v1150_v6 = vstv %s2100_s19  ;;  %v1158_v14 = vstv %s2103_s24 }
 0x1fb   : > { %v1025_v38 = vadd.f32 %v1023_v32, %v1017_v31  ;;  %v1018_v40 = vadd.f32 %v1016_v34, %v1010_v33  ;;  %v1088_v32 = vmul.f32 %v1086_v13, %v1085_v20  ;;  %v1095_v33 = vmul.f32 %v1094_v21, %v1092_v22  ;;  %v1156_v13 = vld [vmem:[#allocation2 + $0x139] sm:$0xff] }
 0x1fc   : > { %v1110_v34 = vstv %s2085_s6  ;;  %v1164_v20 = vld [vmem:[#allocation2 + $0x13a] sm:$0xff]  ;;  %s2129_s6 = scalar_lea.hbm %s2178_s2, %s1432_s3 }
 0x1fd   : > { %v1033_v45 = vadd.f32 %v1031_v39, %v1025_v38  ;;  %v1026_v59 = vadd.f32 %v1024_v41, %v1018_v40  ;;  %v1096_v39 = vmul.f32 %v1094_v21, %v1093_v28  ;;  %v1103_v40 = vmul.f32 %v1102_v27, %v1100_v29 }
 0x1fe   : > { %v1118_v41 = vstv %s2088_s7  ;;  %v1166_v21 = vstv %s2106_s26  ;;  %v1174_v28 = vstv %s2109_s25  ;;  %s1548_s7 = scalar_lea.vmem %s2131_s4, 256 }
 0x1ff   : > { %v1034_v52 = vadd.f32 %v1032_v46, %v1026_v59  ;;  %v1041_v53 = vadd.f32 %v1039_v48, %v1033_v45  ;;  %v1111_v59 = vmul.f32 %v1110_v34, %v1108_v35  ;;  %v1104_v46 = vmul.f32 %v1102_v27, %v1101_v36  ;;  %v1172_v27 = vld [vmem:[#allocation2 + $0x13b] sm:$0xff]  ;;  %p1549_p12 = scmp.ne.s32.totalorder %s2131_s4, %s1548_s7 }
 0x200   : > { %v1126_v48 = vstv %s2091_s16  ;;  %v1182_v35 = vstv %s2112_s20  ;;  %s1629_s16 = smov [#allocation8]  }
 0x201   : > { %v1042_v57 = vadd.f32 %v1040_v58, %v1034_v52  ;;  %v1049_v60 = vadd.f32 %v1047_v54, %v1041_v53  ;;  %v1119_v52 = vmul.f32 %v1118_v41, %v1116_v42  ;;  %v1112_v58 = vmul.f32 %v1110_v34, %v1109_v43  ;;  %v1180_v34 = vld [vmem:[#allocation2 + $0x13c] sm:$0xff]  ;;  %p1550_p2 = pnand %p1549_p12, %p2194_p0 }
 0x202   : > { %v1134_v54 = vstv %s2094_s8  ;;  %v1190_v42 = vstv %s2115_s27  ;;  %s1552_s8 = sshll.u32 %s1629_s16, 4  ;;  %s1553_s8 = int_to_ptr.vmem [resolvable:$false] %s1552_s8 }
 0x203   : > { %v1057_v2 = vadd.f32 %v1055_v61, %v1049_v60  ;;  %v1050_v4 = vadd.f32 %v1048_v62, %v1042_v57  ;;  %v1127_v57 = vmul.f32 %v1126_v48, %v1124_v49  ;;  %v1120_v61 = vmul.f32 %v1118_v41, %v1117_v50  ;;  %v1188_v41 = vld [vmem:[#allocation2 + $0x13d] sm:$0xff]  ;;  %p1551_p7 = pneg %p1550_p2  ;;  %p1555_p8 = scmp.lt.s32.totalorder %s2131_s4, %s1553_s8 }
 0x204   : > { %v1142_v62 = vstv %s2097_s17  ;;  %v1198_v49 = vstv %s2118_s30  ;;  %s1554_s17 = scalar_lea.vmem %s1553_s8, 512 }
 0x205   : > { %v1065_v9 = vadd.f32 %v1063_v3, %v1057_v2  ;;  %v1058_v11 = vadd.f32 %v1056_v5, %v1050_v4  ;;  %v1135_v2 = vmul.f32 %v1134_v54, %v1132_v55  ;;  %v1128_v4 = vmul.f32 %v1126_v48, %v1125_v56  ;;  %v1141_v5 = vld [vmem:[#allocation2 + $0x12e] sm:$0xff]  ;;  %v1196_v48 = vld [vmem:[#allocation2 + $0x13e] sm:$0xff]  ;;  %p1556_p9 = scmp.lt.s32.totalorder %s1554_s17, %s1548_s7 }
 0x207   : > { %v1073_v16 = vadd.f32 %v1071_v10, %v1065_v9  ;;  %v1066_v18 = vadd.f32 %v1064_v12, %v1058_v11  ;;  %v1143_v9 = vmul.f32 %v1142_v62, %v1140_v63  ;;  %v1136_v11 = vmul.f32 %v1134_v54, %v1133_v0  ;;  %v1149_v12 = vld [vmem:[#allocation2 + $0x140] sm:$0xff]  ;;  %p1557_p10 = por %p1556_p9, %p1555_p8 }
 0x208   : > { %v1152_v22 = vmul.f32 %v1150_v6, %v1149_v12 }
 0x209   : > { %v1081_v23 = vadd.f32 %v1079_v17, %v1073_v16  ;;  %v1074_v25 = vadd.f32 %v1072_v19, %v1066_v18  ;;  %v1144_v16 = vmul.f32 %v1142_v62, %v1141_v5  ;;  %v1151_v17 = vmul.f32 %v1150_v6, %v1148_v7  ;;  %v1157_v19 = vld [vmem:[#allocation2 + $0x141] sm:$0xff]  ;;  %p1558_p1 = pnand %p1557_p10, %p1551_p7 }
 0x20b   : > { %v1089_v30 = vadd.f32 %v1087_v24, %v1081_v23  ;;  %v1082_v31 = vadd.f32 %v1080_v26, %v1074_v25  ;;  %v1159_v25 = vmul.f32 %v1158_v14, %v1156_v13  ;;  %v1165_v26 = vld [vmem:[#allocation2 + $0x142] sm:$0xff] }
 0x20d   : > { %v1090_v37 = vadd.f32 %v1088_v32, %v1082_v31  ;;  %v1097_v38 = vadd.f32 %v1095_v33, %v1089_v30  ;;  %v1160_v30 = vmul.f32 %v1158_v14, %v1157_v19  ;;  %v1167_v32 = vmul.f32 %v1166_v21, %v1164_v20  ;;  %v1173_v33 = vld [vmem:[#allocation2 + $0x143] sm:$0xff] }
 0x20f   : > { %v1098_v44 = vadd.f32 %v1096_v39, %v1090_v37  ;;  %v1105_v45 = vadd.f32 %v1103_v40, %v1097_v38  ;;  %v1168_v37 = vmul.f32 %v1166_v21, %v1165_v26  ;;  %v1175_v39 = vmul.f32 %v1174_v28, %v1172_v27  ;;  %v1181_v40 = vld [vmem:[#allocation2 + $0x144] sm:$0xff] }
 0x211   : > { %v1113_v51 = vadd.f32 %v1111_v59, %v1105_v45  ;;  %v1106_v53 = vadd.f32 %v1104_v46, %v1098_v44  ;;  %v1176_v44 = vmul.f32 %v1174_v28, %v1173_v33  ;;  %v1183_v59 = vmul.f32 %v1182_v35, %v1180_v34  ;;  %v1189_v46 = vld [vmem:[#allocation2 + $0x145] sm:$0xff] }
 0x212   : > { %v1192_v55 = vmul.f32 %v1190_v42, %v1189_v46 }
 0x213   : > { %v1121_v47 = vadd.f32 %v1119_v52, %v1113_v51  ;;  %v1114_v60 = vadd.f32 %v1112_v58, %v1106_v53  ;;  %v1184_v51 = vmul.f32 %v1182_v35, %v1181_v40  ;;  %v1191_v53 = vmul.f32 %v1190_v42, %v1188_v41  ;;  %v1197_v58 = vld [vmem:[#allocation2 + $0x146] sm:$0xff] }
 0x215   : > { %v1129_v1 = vadd.f32 %v1127_v57, %v1121_v47  ;;  %v1122_v3 = vadd.f32 %v1120_v61, %v1114_v60  ;;  %v1199_v47 = vmul.f32 %v1198_v49, %v1196_v48  ;;  %v1200_v60 = vmul.f32 %v1198_v49, %v1197_v58 }
 0x217   : > { %v1137_v8 = vadd.f32 %v1135_v2, %v1129_v1  ;;  %v1130_v10 = vadd.f32 %v1128_v4, %v1122_v3 }
 0x219   : > { %v1138_v15 = vadd.f32 %v1136_v11, %v1130_v10  ;;  %v1145_v18 = vadd.f32 %v1143_v9, %v1137_v8 }
 0x21b   : > { %v1146_v23 = vadd.f32 %v1144_v16, %v1138_v15  ;;  %v1153_v24 = vadd.f32 %v1151_v17, %v1145_v18 }
 0x21d   : > { %v1154_v29 = vadd.f32 %v1152_v22, %v1146_v23  ;;  %v1161_v31 = vadd.f32 %v1159_v25, %v1153_v24 }
 0x21f   : > { %v1162_v36 = vadd.f32 %v1160_v30, %v1154_v29  ;;  %v1169_v38 = vadd.f32 %v1167_v32, %v1161_v31 }
 0x221   : > { %v1170_v43 = vadd.f32 %v1168_v37, %v1162_v36  ;;  %v1177_v45 = vadd.f32 %v1175_v39, %v1169_v38 }
 0x223   : > { %v1178_v50 = vadd.f32 %v1176_v44, %v1170_v43  ;;  %v1185_v52 = vadd.f32 %v1183_v59, %v1177_v45 }
 0x225   : > { %v1186_v54 = vadd.f32 %v1184_v51, %v1178_v50  ;;  %v1193_v56 = vadd.f32 %v1191_v53, %v1185_v52 }
 0x227   : > { %v1194_v57 = vadd.f32 %v1192_v55, %v1186_v54  ;;  %v1201_v61 = vadd.f32 %v1199_v47, %v1193_v56 }
 0x229   : > { %v1202_v62 = vadd.f32 %v1200_v60, %v1194_v57  ;;  %v1203_v63 = vmul.f32 0.5, %v1201_v61 }
 0x22b   : > { %v1204_v0 = vmul.f32 0.5, %v1202_v62  ;;  %1501 = vtanh.f32 %v1203_v63 }
 0x22d   : > { %1503 = vtanh.f32 %v1204_v0 }
 0x238   : > { %v1502_v1 = vpop.eup %1501 }
 0x239   : > { %v1207_v2 = vadd.f32 1.0, %v1502_v1 }
 0x23a   : > { %v1504_v3 = vpop.eup %1503 }
 0x23b   : > { %v1208_v4 = vadd.f32 1.0, %v1504_v3  ;;  %v1209_v5 = vmul.f32 0.5, %v1207_v2 }
 0x23d   : > { %v1210_v6 = vmul.f32 0.5, %v1208_v4  ;;  %1211 = vst.msk [vmem:[%s175_s23] sm:$0xff] %vm228_vm3, %v1209_v5 }
 0x23f   : > { %1212 = vst.msk [vmem:[%s175_s23 + $0x8] sm:$0xff] %vm228_vm3, %v1210_v6 }
 0x240   : > { %1561 = shalt.err (!%p1558_p1)
}
 0x241   : > { %s1562_s19 = scalar_lea.hbm %s2129_s6, 256  ;;  %s1566_s25 = scalar_lea.hbm %s2178_s2, 512 }
 0x242   : > { %p1563_p4 = scmp.ne.s32.totalorder %s2129_s6, %s1562_s19  ;;  %p1567_p6 = scmp.lt.s32.totalorder %s2129_s6, %s2178_s2 }
 0x243   : > { %p1568_p13 = scmp.lt.s32.totalorder %s1566_s25, %s1562_s19 }
 0x244   : > { %p1564_p11 = pnand %p1563_p4, %p2194_p0 }
 0x245   : > { %p1569_p3 = por %p1568_p13, %p1567_p6 }
 0x246   : > { %p1565_p5 = pneg %p1564_p11 }
 0x248   : > { %p1570_p12 = pnand %p1569_p3, %p1565_p5 }
 0x24a   : > { %1573 = shalt.err (!%p1570_p12)
}
 0x24b   : > { %s1630_s30 = smov 128   ;;  %s1631_s28 = smov 8  }
 0x24c   : > { %1439 = dma.vmem_to_hbm [thread:$0]  (%p2194_p0), %s2131_s4, 256, %s2129_s6, %s1214_s13, %s1630_s30, %s1630_s30, %s1631_s28  }
 0x24d PF: > { %s1242_s3 = sand.u32 1, %s1604_s9   ;;  %p2195_p2 = scmp.ne.s32.totalorder %s2186_s22, 0 }
 0x24e   : > { %p2196_p7 = scmp.ge.s32.totalorder %s1616_s12, 2  ;;  %s1243_s23 = scalar_lea.sflag [#allocation5], %s1242_s3 }
 0x250   : > { %p1450_p8 = pnand %p2196_p7, %p2195_p2 }
 0x252   : > { %p1451_p9 = pneg %p1450_p8 }
 0x254   : > { %1599 = dma.done.wait (%p1451_p9), %s1243_s23, 256  }
 0x255   : > { %1601 = vsyncadd (%p1451_p9), %s1243_s23, 4294967040  ;;  %p16_p10 = scmp.ge.s32.totalorder %s1672_s15, 4   ;;  %s2197_s9 = smov %s1608_s10 }
 0x256   : > { %s2198_s10 = smov %s1612_s11  ;;  %s2199_s11 = smov %s1684_s18 }
 0x257   : > { %s2200_s12 = smov %s1672_s15  ;;  %18 = sbr.rel (!%p16_p10) target bundleno = 6 (0x6), region = 94 }
 0x25c   :  { %1248 = vsyncpa [#allocation4], 1 }
 0x25d   :  { %1250 = vsyncpa [#allocation4 + $0x1], 1 }
 0x25e   :  { %1251 = vsyncpa [#allocation5], 1 }
 0x25f   :  { %1253 = vsyncpa [#allocation5 + $0x1], 1 }
 0x260   :  { %1254 = vsyncpa [#allocation6], 1 }
 0x261   :  { %1256 = vsyncpa [#allocation6 + $0x1], 1 }

</bundles_post_ra>
